<compile_context>
chip_gen: v7x
topology: tpu7x:2x2x1
jax: 0.10.0
libtpu: 0.0.40
codegen_flags: <defaults>
</compile_context>

<pallas_src>
import functools

import numpy as np
import jax
import jax.numpy as jnp
from jax.experimental import pallas as pl
from jax.experimental.pallas import tpu as pltpu


def _round_up(x, m):
    return (x + m - 1) // m * m


# ----------------------------------------------------------------------------
# Pallas kernel: "flat row" convolution on a space-to-depth input.
#
# Per image the input ref holds the space-to-depth'ed activation flattened to
# (Lin, K) rows: row a*Wf + b is folded spatial position (a, b), K = s*s*Cin
# channels, zero padded so every slice below stays in bounds.  The conv is then
#
#     out[r, :] = sum_{p<kh', q<kw'}  x[p*Wf + q + r, :] @ W[p, q]      (+bias)
#
# with r = oh*Wf + ow, i.e. kh'*kw' unit-stride row slices, each pushed through
# the MXU and accumulated in f32.  Rows with ow >= wo are "garbage" (they mix
# neighbouring spatial rows) but remain finite and are never consumed by a
# valid read downstream (the dense weight has zero rows for them).
# ----------------------------------------------------------------------------
def _conv_flat_kernel(x_ref, w_ref, b_ref, o_ref, *, n_terms, kwq, wf,
                      out_rows, apply_relu):
    cout = o_ref.shape[-1]
    acc = jnp.zeros((out_rows, cout), jnp.float32)
    for t in range(n_terms):                       # short, statically unrolled
        p, q = divmod(t, kwq)
        xs = x_ref[pl.ds(p * wf + q, out_rows), :]  # (out_rows, K) unit stride
        acc = acc + jnp.dot(xs, w_ref[t], preferred_element_type=jnp.float32)
    acc = acc + b_ref[...]                          # (1, Cout) broadcast, f32
    if apply_relu:
        acc = jnp.maximum(acc, 0.0)
    o_ref[...] = acc.astype(o_ref.dtype)


def conv_flat(x_flat, w_terms, bias, *, kwq, wf, out_rows, apply_relu,
              out_dtype):
    """x_flat: (N, Lin, K); w_terms: (n_terms, K, Cout); bias: (1, Cout) f32."""
    n, lin, k = x_flat.shape
    n_terms, k2, cout = w_terms.shape
    assert k == k2
    khq = n_terms // kwq
    assert (khq - 1) * wf + (kwq - 1) + out_rows <= lin, "input under-padded"

    kernel = functools.partial(_conv_flat_kernel, n_terms=n_terms, kwq=kwq,
                               wf=wf, out_rows=out_rows, apply_relu=apply_relu)
    return pl.pallas_call(
        kernel,
        grid=(n,),
        out_shape=jax.ShapeDtypeStruct((n, out_rows, cout), out_dtype),
        in_specs=[
            pl.BlockSpec((None, lin, k), lambda i: (i, 0, 0)),      # per image
            pl.BlockSpec((n_terms, k2, cout), lambda i: (0, 0, 0)),  # resident
            pl.BlockSpec((1, cout), lambda i: (0, 0)),               # resident
        ],
        out_specs=pl.BlockSpec((None, out_rows, cout), lambda i: (i, 0, 0)),
        compiler_params=pltpu.CompilerParams(
            dimension_semantics=("parallel",)),
    )(x_flat, w_terms, bias)


# ----------------------------------------------------------------------------
# Pallas kernel: dense layer, tiled over batch rows (K and F kept whole).
# ----------------------------------------------------------------------------
def _dense_kernel(x_ref, w_ref, b_ref, o_ref):
    acc = jnp.dot(x_ref[...], w_ref[...], preferred_element_type=jnp.float32)
    o_ref[...] = (acc + b_ref[...]).astype(o_ref.dtype)


def dense(x, w, bias, *, out_dtype=jnp.float32):
    """x: (N, K); w: (K, F); bias: (1, F) f32."""
    n, k = x.shape
    k2, f = w.shape
    assert k == k2
    tm = 128 if n >= 128 else _round_up(n, 8)
    n_pad = _round_up(n, tm)
    if n_pad != n:
        x = jnp.pad(x, ((0, n_pad - n), (0, 0)))
    out = pl.pallas_call(
        _dense_kernel,
        grid=(n_pad // tm,),
        out_shape=jax.ShapeDtypeStruct((n_pad, f), out_dtype),
        in_specs=[
            pl.BlockSpec((tm, k), lambda i: (i, 0)),
            pl.BlockSpec((k, f), lambda i: (0, 0)),
            pl.BlockSpec((1, f), lambda i: (0, 0)),
        ],
        out_specs=pl.BlockSpec((tm, f), lambda i: (i, 0)),
        compiler_params=pltpu.CompilerParams(
            dimension_semantics=("parallel",)),
    )(x, w, bias)
    return out[:n] if n_pad != n else out


# ----------------------------------------------------------------------------
# Init-time weight packing (all per-call layout work removed from the hot path)
# ----------------------------------------------------------------------------
def _pack_conv_weight(w_oihw, s):
    """PyTorch conv weight (Cout, Cin, kh, kw) -> (kh/s*kw/s, s*s*Cin, Cout)
    per-offset matmul weights matching the space-to-depth channel order."""
    cout, cin, kh, kw = w_oihw.shape
    assert kh % s == 0 and kw % s == 0
    w = jnp.transpose(w_oihw, (2, 3, 1, 0))              # (kh, kw, Cin, Cout)
    w = w.reshape(kh // s, s, kw // s, s, cin, cout)
    w = jnp.transpose(w, (0, 2, 1, 3, 4, 5))             # (kh', kw', s, s, Ci, Co)
    return w.reshape((kh // s) * (kw // s), s * s * cin, cout)


def _pack_dense_weight(wd_torch, h3, w3, wf3, c3):
    """PyTorch Linear weight (F, C3*h3*w3) -> (h3*wf3*C3, F) matching the flat
    conv3 kernel output (channel-last rows, zero rows for garbage columns)."""
    f = wd_torch.shape[0]
    rows3 = h3 * wf3
    r = jnp.arange(rows3)
    oh, ow = r // wf3, r % wf3
    valid = ow < w3
    ow_c = jnp.minimum(ow, w3 - 1)
    c = jnp.arange(c3)
    torch_idx = c[None, :] * (h3 * w3) + (oh * w3 + ow_c)[:, None]   # (rows3, C3)
    gathered = wd_torch.T[torch_idx]                                 # (rows3, C3, F)
    gathered = jnp.where(valid[:, None, None], gathered, 0.0)
    return gathered.reshape(rows3 * c3, f)


# ----------------------------------------------------------------------------
# FeatureExtractor
# ----------------------------------------------------------------------------
class FeatureExtractorPallas:
    def __init__(self, feature_size, base_depth, input_shape, key,
                 compute_dtype=jnp.bfloat16):
        self._feature_size = feature_size
        self._input_shape = tuple(input_shape)           # (C, H, W)
        self._dtype = compute_dtype
        c0, h0, w0 = input_shape

        def _out(v, k, s):
            return (v - k) // s + 1

        # True conv output sizes (valid padding) — mirrors _get_conv_output_shape.
        h1, w1 = _out(h0, 8, 4), _out(w0, 8, 4)
        h2, w2 = _out(h1, 4, 2), _out(w1, 4, 2)
        h3, w3 = _out(h2, 3, 1), _out(w2, 3, 1)
        c1, c2, c3 = base_depth, 2 * base_depth, 2 * base_depth
        self._conv_output_shape = (1, c3, h3, w3)
        flat_torch = int(np.prod(self._conv_output_shape))

        # Folded (space-to-depth) geometry per layer.
        self._hp0, self._wp0 = _round_up(h0, 4), _round_up(w0, 4)
        self._wf1 = self._wp0 // 4
        hf1 = self._hp0 // 4
        self._rows1 = h1 * self._wf1                                  # extra=0
        self._lin1 = max(hf1 * self._wf1, self._wf1 + 1 + self._rows1)

        self._hp1, self._wp1 = _round_up(h1, 2), _round_up(self._wf1, 2)
        self._wf2 = self._wp1 // 2
        hf2 = self._hp1 // 2
        self._rows2 = h2 * self._wf2 + (3 - 1)          # +2 rows read by conv3
        self._lin2 = max(hf2 * self._wf2, self._wf2 + 1 + self._rows2)

        self._wf3 = self._wf2
        self._rows3 = h3 * self._wf3
        assert 2 * self._wf3 + 2 + self._rows3 <= self._rows2
        self._dims = (h0, w0, h1, w1, h2, w2, h3, w3)

        # Parameters in PyTorch layout (what nn.Conv2d / nn.Linear would hold).
        ks = jax.random.split(key, 8)

        def _uniform(k, shape, fan_in):
            b = 1.0 / np.sqrt(fan_in)
            return jax.random.uniform(k, shape, jnp.float32, -b, b)

        w1t = _uniform(ks[0], (c1, c0, 8, 8), c0 * 64)
        b1t = _uniform(ks[1], (c1,), c0 * 64)
        w2t = _uniform(ks[2], (c2, c1, 4, 4), c1 * 16)
        b2t = _uniform(ks[3], (c2,), c1 * 16)
        w3t = _uniform(ks[4], (c3, c2, 3, 3), c2 * 9)
        b3t = _uniform(ks[5], (c3,), c2 * 9)
        wdt = _uniform(ks[6], (feature_size, flat_torch), flat_torch)
        bdt = _uniform(ks[7], (feature_size,), flat_torch)
        self.torch_params = dict(w1=w1t, b1=b1t, w2=w2t, b2=b2t, w3=w3t,
                                 b3=b3t, wd=wdt, bd=bdt)

        dt = compute_dtype
        self._w1 = _pack_conv_weight(w1t, 4).astype(dt)   # (4, 16*c0, c1)
        self._w2 = _pack_conv_weight(w2t, 2).astype(dt)   # (4, 4*c1,  c2)
        self._w3 = _pack_conv_weight(w3t, 1).astype(dt)   # (9, c2,    c3)
        self._b1 = b1t.reshape(1, c1)
        self._b2 = b2t.reshape(1, c2)
        self._b3 = b3t.reshape(1, c3)
        self._wd = _pack_dense_weight(wdt, h3, w3, self._wf3, c3).astype(dt)
        self._bd = bdt.reshape(1, feature_size)

        self._forward = jax.jit(self._forward_impl)

    # ------------------------------------------------------------------ #
    def format_obs(self, obs):
        obs = obs / 255.0
        if obs.ndim < 3:
            raise ValueError('Observations must have at least 3 dimensions')
        if obs.ndim == 3:
            obs = obs[None]
        return obs.astype(jnp.float32)

    def __call__(self, img):
        return self._forward(img)

    def _forward_impl(self, img):
        img = self.format_obs(img)                       # (N, C, H, W) f32
        h0, w0, h1, w1, h2, w2, h3, w3 = self._dims
        n, c0 = img.shape[0], img.shape[1]
        dt = self._dtype

        # conv1: NCHW -> space-to-depth(4) flat rows (one fused XLA transpose).
        x = img.astype(dt)
        if (self._hp0, self._wp0) != (h0, w0):
            x = jnp.pad(x, ((0, 0), (0, 0), (0, self._hp0 - h0),
                            (0, self._wp0 - w0)))
        hf1, wf1 = self._hp0 // 4, self._wf1
        x = x.reshape(n, c0, hf1, 4, wf1, 4)
        x = jnp.transpose(x, (0, 2, 4, 3, 5, 1))         # (N, hf1, wf1, 4, 4, C)
        x = x.reshape(n, hf1 * wf1, 16 * c0)
        if self._lin1 > hf1 * wf1:
            x = jnp.pad(x, ((0, 0), (0, self._lin1 - hf1 * wf1), (0, 0)))
        y1 = conv_flat(x, self._w1, self._b1, kwq=2, wf=wf1,
                       out_rows=self._rows1, apply_relu=True, out_dtype=dt)

        # conv2: conv1 output grid -> space-to-depth(2) flat rows.
        c1 = y1.shape[-1]
        y1 = y1.reshape(n, h1, wf1, c1)
        if (self._hp1, self._wp1) != (h1, wf1):
            y1 = jnp.pad(y1, ((0, 0), (0, self._hp1 - h1),
                              (0, self._wp1 - wf1), (0, 0)))
        hf2, wf2 = self._hp1 // 2, self._wf2
        y1 = y1.reshape(n, hf2, 2, wf2, 2, c1)
        y1 = jnp.transpose(y1, (0, 1, 3, 2, 4, 5))
        y1 = y1.reshape(n, hf2 * wf2, 4 * c1)
        if self._lin2 > hf2 * wf2:
            y1 = jnp.pad(y1, ((0, 0), (0, self._lin2 - hf2 * wf2), (0, 0)))
        y2 = conv_flat(y1, self._w2, self._b2, kwq=2, wf=wf2,
                       out_rows=self._rows2, apply_relu=True, out_dtype=dt)

        # conv3 (stride 1): consumes conv2's kernel output directly (no glue).
        y3 = conv_flat(y2, self._w3, self._b3, kwq=3, wf=self._wf3,
                       out_rows=self._rows3, apply_relu=True, out_dtype=dt)

        # dense: free reshape; weight rows pre-permuted / zeroed at init.
        feats = y3.reshape(n, self._rows3 * y3.shape[-1])
        return dense(feats, self._wd, self._bd, out_dtype=jnp.float32)


# ----------------------------------------------------------------------------
if __name__ == "__main__":
    key = jax.random.PRNGKey(0)
    k_param, k_data = jax.random.split(key)

    # Small Atari-like setup: conv1 -> 12x12, conv2 -> 5x5, conv3 -> 3x3.
    feature_size, base_depth = 32, 8
    input_shape = (4, 52, 52)
    batch = 2

    x = jax.random.randint(k_data, (batch,) + input_shape, 0, 256,
                           dtype=jnp.int32).astype(jnp.float32)

    # f32 path: validate the full layout pipeline against plain XLA convs.
    model_f32 = FeatureExtractorPallas(feature_size, base_depth, input_shape,
                                       k_param, compute_dtype=jnp.float32)
    out_f32 = jax.block_until_ready(model_f32(x))

    p = model_f32.torch_params

    def _reference(img):
        z = img / 255.0
        for w, b, s in ((p['w1'], p['b1'], 4), (p['w2'], p['b2'], 2),
                        (p['w3'], p['b3'], 1)):
            z = jax.lax.conv_general_dilated(
                z, w, (s, s), 'VALID',
                dimension_numbers=('NCHW', 'OIHW', 'NCHW'),
                precision=jax.lax.Precision.HIGHEST)
            z = jax.nn.relu(z + b.reshape(1, -1, 1, 1))
        z = z.reshape(img.shape[0], -1)
        return z @ p['wd'].T + p['bd']

    ref = jax.block_until_ready(_reference(x))
    assert out_f32.shape == (batch, feature_size), out_f32.shape
    rel = jnp.max(jnp.abs(out_f32 - ref)) / (jnp.max(jnp.abs(ref)) + 1e-6)
    assert float(rel) < 3e-2, f"mismatch vs XLA reference: rel err {rel}"

    # bf16 path (recommended performance configuration on v6e / v7x).
    model = FeatureExtractorPallas(feature_size, base_depth, input_shape,
                                   k_param)
    out = jax.block_until_ready(model(x))
    assert out.shape == (batch, feature_size), out.shape
    assert bool(jnp.all(jnp.isfinite(out)))
    print("KERNEL_OK")
</pallas_src>

<mosaic_0001>
module attributes {stable_mosaic.version = 11 : i64} {
  func.func @_conv_flat_kernel(%arg0: i32, %arg1: memref<1x170x64xf32, #tpu.memory_space<vmem>>, %arg2: memref<4x64x8xf32, #tpu.memory_space<vmem>>, %arg3: memref<1x8xf32, #tpu.memory_space<vmem>>, %arg4: memref<1x156x8xf32, #tpu.memory_space<vmem>>) attributes {dimension_semantics = [#tpu.dimension_semantics<parallel>], iteration_bounds = array<i64: 2>, scalar_prefetch = 0 : i64, scratch_operands = 0 : i64, tpu.core_type = #tpu.core_type<tc>, window_params = [{transform_indices = @transform_0, window_bounds = array<i64: 1, 170, 64>}, {pipeline_mode = #tpu.pipeline_mode<synchronous>, transform_indices = @transform_1, window_bounds = array<i64: 4, 64, 8>}, {pipeline_mode = #tpu.pipeline_mode<synchronous>, transform_indices = @transform_2, window_bounds = array<i64: 1, 8>}, {transform_indices = @transform_3, window_bounds = array<i64: 1, 156, 8>}]} {
    %cst = arith.constant 0.000000e+00 : f32
    %0 = vector.broadcast %cst : f32 to vector<156x8xf32>
    %c0 = arith.constant 0 : index
    %c0_0 = arith.constant 0 : index
    %c0_1 = arith.constant 0 : index
    %1 = vector.load %arg1[%c0, %c0_0, %c0_1] : memref<1x170x64xf32, #tpu.memory_space<vmem>>, vector<1x156x64xf32>
    %2 = vector.shape_cast %1 : vector<1x156x64xf32> to vector<156x64xf32>
    %c0_2 = arith.constant 0 : index
    %c0_3 = arith.constant 0 : index
    %c0_4 = arith.constant 0 : index
    %3 = vector.load %arg2[%c0_2, %c0_3, %c0_4] : memref<4x64x8xf32, #tpu.memory_space<vmem>>, vector<1x64x8xf32>
    %4 = vector.shape_cast %3 : vector<1x64x8xf32> to vector<64x8xf32>
    %cst_5 = arith.constant dense<0.000000e+00> : vector<156x8xf32>
    %5 = tpu.matmul %2, %4, %cst_5 {dimension_numbers = #tpu.dot_dimension_numbers<[1], [0], [0], [1], [0, 0, 1, 1], [], []>} : vector<156x64xf32>, vector<64x8xf32>, vector<156x8xf32> -> vector<156x8xf32>
    %6 = arith.addf %0, %5 : vector<156x8xf32>
    %c0_6 = arith.constant 0 : index
    %c1 = arith.constant 1 : index
    %c0_7 = arith.constant 0 : index
    %7 = vector.load %arg1[%c0_6, %c1, %c0_7] : memref<1x170x64xf32, #tpu.memory_space<vmem>>, vector<1x156x64xf32>
    %8 = vector.shape_cast %7 : vector<1x156x64xf32> to vector<156x64xf32>
    %c1_8 = arith.constant 1 : index
    %c0_9 = arith.constant 0 : index
    %c0_10 = arith.constant 0 : index
    %9 = vector.load %arg2[%c1_8, %c0_9, %c0_10] : memref<4x64x8xf32, #tpu.memory_space<vmem>>, vector<1x64x8xf32>
    %10 = vector.shape_cast %9 : vector<1x64x8xf32> to vector<64x8xf32>
    %cst_11 = arith.constant dense<0.000000e+00> : vector<156x8xf32>
    %11 = tpu.matmul %8, %10, %cst_11 {dimension_numbers = #tpu.dot_dimension_numbers<[1], [0], [0], [1], [0, 0, 1, 1], [], []>} : vector<156x64xf32>, vector<64x8xf32>, vector<156x8xf32> -> vector<156x8xf32>
    %12 = arith.addf %6, %11 : vector<156x8xf32>
    %c0_12 = arith.constant 0 : index
    %c13 = arith.constant 13 : index
    %c0_13 = arith.constant 0 : index
    %13 = vector.load %arg1[%c0_12, %c13, %c0_13] : memref<1x170x64xf32, #tpu.memory_space<vmem>>, vector<1x156x64xf32>
    %14 = vector.shape_cast %13 : vector<1x156x64xf32> to vector<156x64xf32>
    %c2 = arith.constant 2 : index
    %c0_14 = arith.constant 0 : index
    %c0_15 = arith.constant 0 : index
    %15 = vector.load %arg2[%c2, %c0_14, %c0_15] : memref<4x64x8xf32, #tpu.memory_space<vmem>>, vector<1x64x8xf32>
    %16 = vector.shape_cast %15 : vector<1x64x8xf32> to vector<64x8xf32>
    %cst_16 = arith.constant dense<0.000000e+00> : vector<156x8xf32>
    %17 = tpu.matmul %14, %16, %cst_16 {dimension_numbers = #tpu.dot_dimension_numbers<[1], [0], [0], [1], [0, 0, 1, 1], [], []>} : vector<156x64xf32>, vector<64x8xf32>, vector<156x8xf32> -> vector<156x8xf32>
    %18 = arith.addf %12, %17 : vector<156x8xf32>
    %c0_17 = arith.constant 0 : index
    %c14 = arith.constant 14 : index
    %c0_18 = arith.constant 0 : index
    %19 = vector.load %arg1[%c0_17, %c14, %c0_18] : memref<1x170x64xf32, #tpu.memory_space<vmem>>, vector<1x156x64xf32>
    %20 = vector.shape_cast %19 : vector<1x156x64xf32> to vector<156x64xf32>
    %c3 = arith.constant 3 : index
    %c0_19 = arith.constant 0 : index
    %c0_20 = arith.constant 0 : index
    %21 = vector.load %arg2[%c3, %c0_19, %c0_20] : memref<4x64x8xf32, #tpu.memory_space<vmem>>, vector<1x64x8xf32>
    %22 = vector.shape_cast %21 : vector<1x64x8xf32> to vector<64x8xf32>
    %cst_21 = arith.constant dense<0.000000e+00> : vector<156x8xf32>
    %23 = tpu.matmul %20, %22, %cst_21 {dimension_numbers = #tpu.dot_dimension_numbers<[1], [0], [0], [1], [0, 0, 1, 1], [], []>} : vector<156x64xf32>, vector<64x8xf32>, vector<156x8xf32> -> vector<156x8xf32>
    %24 = arith.addf %18, %23 : vector<156x8xf32>
    %c0_22 = arith.constant 0 : index
    %c0_23 = arith.constant 0 : index
    %25 = vector.load %arg3[%c0_22, %c0_23] : memref<1x8xf32, #tpu.memory_space<vmem>>, vector<1x8xf32>
    %26 = vector.broadcast %25 : vector<1x8xf32> to vector<156x8xf32>
    %27 = arith.addf %24, %26 : vector<156x8xf32>
    %cst_24 = arith.constant 0.000000e+00 : f32
    %28 = vector.broadcast %cst_24 : f32 to vector<156x8xf32>
    %29 = arith.maximumf %27, %28 : vector<156x8xf32>
    %c0_25 = arith.constant 0 : index
    %c0_26 = arith.constant 0 : index
    %c0_27 = arith.constant 0 : index
    %30 = vector.load %arg4[%c0_25, %c0_26, %c0_27] : memref<1x156x8xf32, #tpu.memory_space<vmem>>, vector<1x156x8xf32>
    %31 = vector.shape_cast %30 : vector<1x156x8xf32> to vector<156x8xf32>
    %32 = vector.shape_cast %29 : vector<156x8xf32> to vector<1x156x8xf32>
    tpu.vector_store %arg4[%c0_25, %c0_26, %c0_27], %32 {strides = array<i32>} : memref<1x156x8xf32, #tpu.memory_space<vmem>>, vector<1x156x8xf32>,
    return
  }
  func.func @transform_0(%arg0: i32) -> (i32, i32, i32) {
    %c0_i32 = arith.constant 0 : i32
    %c0_i32_0 = arith.constant 0 : i32
    %c0_i32_1 = arith.constant 0 : i32
    return %arg0, %c0_i32, %c0_i32_0 : i32, i32, i32
  }
  func.func @transform_1(%arg0: i32) -> (i32, i32, i32) {
    %c0_i32 = arith.constant 0 : i32
    %c0_i32_0 = arith.constant 0 : i32
    %c0_i32_1 = arith.constant 0 : i32
    %c0_i32_2 = arith.constant 0 : i32
    return %c0_i32, %c0_i32_0, %c0_i32_1 : i32, i32, i32
  }
  func.func @transform_2(%arg0: i32) -> (i32, i32) {
    %c0_i32 = arith.constant 0 : i32
    %c0_i32_0 = arith.constant 0 : i32
    %c0_i32_1 = arith.constant 0 : i32
    return %c0_i32, %c0_i32_0 : i32, i32
  }
  func.func @transform_3(%arg0: i32) -> (i32, i32, i32) {
    %c0_i32 = arith.constant 0 : i32
    %c0_i32_0 = arith.constant 0 : i32
    %c0_i32_1 = arith.constant 0 : i32
    return %arg0, %c0_i32, %c0_i32_0 : i32, i32, i32
  }
}

module attributes {stable_mosaic.version = 11 : i64} {
  func.func @_conv_flat_kernel(%arg0: i32, %arg1: memref<1x45x32xf32, #tpu.memory_space<vmem>>, %arg2: memref<4x32x16xf32, #tpu.memory_space<vmem>>, %arg3: memref<1x16xf32, #tpu.memory_space<vmem>>, %arg4: memref<1x37x16xf32, #tpu.memory_space<vmem>>) attributes {dimension_semantics = [#tpu.dimension_semantics<parallel>], iteration_bounds = array<i64: 2>, scalar_prefetch = 0 : i64, scratch_operands = 0 : i64, tpu.core_type = #tpu.core_type<tc>, window_params = [{transform_indices = @transform_0, window_bounds = array<i64: 1, 45, 32>}, {pipeline_mode = #tpu.pipeline_mode<synchronous>, transform_indices = @transform_1, window_bounds = array<i64: 4, 32, 16>}, {pipeline_mode = #tpu.pipeline_mode<synchronous>, transform_indices = @transform_2, window_bounds = array<i64: 1, 16>}, {transform_indices = @transform_3, window_bounds = array<i64: 1, 37, 16>}]} {
    %cst = arith.constant 0.000000e+00 : f32
    %0 = vector.broadcast %cst : f32 to vector<37x16xf32>
    %c0 = arith.constant 0 : index
    %c0_0 = arith.constant 0 : index
    %c0_1 = arith.constant 0 : index
    %1 = vector.load %arg1[%c0, %c0_0, %c0_1] : memref<1x45x32xf32, #tpu.memory_space<vmem>>, vector<1x37x32xf32>
    %2 = vector.shape_cast %1 : vector<1x37x32xf32> to vector<37x32xf32>
    %c0_2 = arith.constant 0 : index
    %c0_3 = arith.constant 0 : index
    %c0_4 = arith.constant 0 : index
    %3 = vector.load %arg2[%c0_2, %c0_3, %c0_4] : memref<4x32x16xf32, #tpu.memory_space<vmem>>, vector<1x32x16xf32>
    %4 = vector.shape_cast %3 : vector<1x32x16xf32> to vector<32x16xf32>
    %cst_5 = arith.constant dense<0.000000e+00> : vector<37x16xf32>
    %5 = tpu.matmul %2, %4, %cst_5 {dimension_numbers = #tpu.dot_dimension_numbers<[1], [0], [0], [1], [0, 0, 1, 1], [], []>} : vector<37x32xf32>, vector<32x16xf32>, vector<37x16xf32> -> vector<37x16xf32>
    %6 = arith.addf %0, %5 : vector<37x16xf32>
    %c0_6 = arith.constant 0 : index
    %c1 = arith.constant 1 : index
    %c0_7 = arith.constant 0 : index
    %7 = vector.load %arg1[%c0_6, %c1, %c0_7] : memref<1x45x32xf32, #tpu.memory_space<vmem>>, vector<1x37x32xf32>
    %8 = vector.shape_cast %7 : vector<1x37x32xf32> to vector<37x32xf32>
    %c1_8 = arith.constant 1 : index
    %c0_9 = arith.constant 0 : index
    %c0_10 = arith.constant 0 : index
    %9 = vector.load %arg2[%c1_8, %c0_9, %c0_10] : memref<4x32x16xf32, #tpu.memory_space<vmem>>, vector<1x32x16xf32>
    %10 = vector.shape_cast %9 : vector<1x32x16xf32> to vector<32x16xf32>
    %cst_11 = arith.constant dense<0.000000e+00> : vector<37x16xf32>
    %11 = tpu.matmul %8, %10, %cst_11 {dimension_numbers = #tpu.dot_dimension_numbers<[1], [0], [0], [1], [0, 0, 1, 1], [], []>} : vector<37x32xf32>, vector<32x16xf32>, vector<37x16xf32> -> vector<37x16xf32>
    %12 = arith.addf %6, %11 : vector<37x16xf32>
    %c0_12 = arith.constant 0 : index
    %c7 = arith.constant 7 : index
    %c0_13 = arith.constant 0 : index
    %13 = vector.load %arg1[%c0_12, %c7, %c0_13] : memref<1x45x32xf32, #tpu.memory_space<vmem>>, vector<1x37x32xf32>
    %14 = vector.shape_cast %13 : vector<1x37x32xf32> to vector<37x32xf32>
    %c2 = arith.constant 2 : index
    %c0_14 = arith.constant 0 : index
    %c0_15 = arith.constant 0 : index
    %15 = vector.load %arg2[%c2, %c0_14, %c0_15] : memref<4x32x16xf32, #tpu.memory_space<vmem>>, vector<1x32x16xf32>
    %16 = vector.shape_cast %15 : vector<1x32x16xf32> to vector<32x16xf32>
    %cst_16 = arith.constant dense<0.000000e+00> : vector<37x16xf32>
    %17 = tpu.matmul %14, %16, %cst_16 {dimension_numbers = #tpu.dot_dimension_numbers<[1], [0], [0], [1], [0, 0, 1, 1], [], []>} : vector<37x32xf32>, vector<32x16xf32>, vector<37x16xf32> -> vector<37x16xf32>
    %18 = arith.addf %12, %17 : vector<37x16xf32>
    %c0_17 = arith.constant 0 : index
    %c8 = arith.constant 8 : index
    %c0_18 = arith.constant 0 : index
    %19 = vector.load %arg1[%c0_17, %c8, %c0_18] : memref<1x45x32xf32, #tpu.memory_space<vmem>>, vector<1x37x32xf32>
    %20 = vector.shape_cast %19 : vector<1x37x32xf32> to vector<37x32xf32>
    %c3 = arith.constant 3 : index
    %c0_19 = arith.constant 0 : index
    %c0_20 = arith.constant 0 : index
    %21 = vector.load %arg2[%c3, %c0_19, %c0_20] : memref<4x32x16xf32, #tpu.memory_space<vmem>>, vector<1x32x16xf32>
    %22 = vector.shape_cast %21 : vector<1x32x16xf32> to vector<32x16xf32>
    %cst_21 = arith.constant dense<0.000000e+00> : vector<37x16xf32>
    %23 = tpu.matmul %20, %22, %cst_21 {dimension_numbers = #tpu.dot_dimension_numbers<[1], [0], [0], [1], [0, 0, 1, 1], [], []>} : vector<37x32xf32>, vector<32x16xf32>, vector<37x16xf32> -> vector<37x16xf32>
    %24 = arith.addf %18, %23 : vector<37x16xf32>
    %c0_22 = arith.constant 0 : index
    %c0_23 = arith.constant 0 : index
    %25 = vector.load %arg3[%c0_22, %c0_23] : memref<1x16xf32, #tpu.memory_space<vmem>>, vector<1x16xf32>
    %26 = vector.broadcast %25 : vector<1x16xf32> to vector<37x16xf32>
    %27 = arith.addf %24, %26 : vector<37x16xf32>
    %cst_24 = arith.constant 0.000000e+00 : f32
    %28 = vector.broadcast %cst_24 : f32 to vector<37x16xf32>
    %29 = arith.maximumf %27, %28 : vector<37x16xf32>
    %c0_25 = arith.constant 0 : index
    %c0_26 = arith.constant 0 : index
    %c0_27 = arith.constant 0 : index
    %30 = vector.load %arg4[%c0_25, %c0_26, %c0_27] : memref<1x37x16xf32, #tpu.memory_space<vmem>>, vector<1x37x16xf32>
    %31 = vector.shape_cast %30 : vector<1x37x16xf32> to vector<37x16xf32>
    %32 = vector.shape_cast %29 : vector<37x16xf32> to vector<1x37x16xf32>
    tpu.vector_store %arg4[%c0_25, %c0_26, %c0_27], %32 {strides = array<i32>} : memref<1x37x16xf32, #tpu.memory_space<vmem>>, vector<1x37x16xf32>,
    return
  }
  func.func @transform_0(%arg0: i32) -> (i32, i32, i32) {
    %c0_i32 = arith.constant 0 : i32
    %c0_i32_0 = arith.constant 0 : i32
    %c0_i32_1 = arith.constant 0 : i32
    return %arg0, %c0_i32, %c0_i32_0 : i32, i32, i32
  }
  func.func @transform_1(%arg0: i32) -> (i32, i32, i32) {
    %c0_i32 = arith.constant 0 : i32
    %c0_i32_0 = arith.constant 0 : i32
    %c0_i32_1 = arith.constant 0 : i32
    %c0_i32_2 = arith.constant 0 : i32
    return %c0_i32, %c0_i32_0, %c0_i32_1 : i32, i32, i32
  }
  func.func @transform_2(%arg0: i32) -> (i32, i32) {
    %c0_i32 = arith.constant 0 : i32
    %c0_i32_0 = arith.constant 0 : i32
    %c0_i32_1 = arith.constant 0 : i32
    return %c0_i32, %c0_i32_0 : i32, i32
  }
  func.func @transform_3(%arg0: i32) -> (i32, i32, i32) {
    %c0_i32 = arith.constant 0 : i32
    %c0_i32_0 = arith.constant 0 : i32
    %c0_i32_1 = arith.constant 0 : i32
    return %arg0, %c0_i32, %c0_i32_0 : i32, i32, i32
  }
}

module attributes {stable_mosaic.version = 11 : i64} {
  func.func @_conv_flat_kernel(%arg0: i32, %arg1: memref<1x37x16xf32, #tpu.memory_space<vmem>>, %arg2: memref<9x16x16xf32, #tpu.memory_space<vmem>>, %arg3: memref<1x16xf32, #tpu.memory_space<vmem>>, %arg4: memref<1x21x16xf32, #tpu.memory_space<vmem>>) attributes {dimension_semantics = [#tpu.dimension_semantics<parallel>], iteration_bounds = array<i64: 2>, scalar_prefetch = 0 : i64, scratch_operands = 0 : i64, tpu.core_type = #tpu.core_type<tc>, window_params = [{transform_indices = @transform_0, window_bounds = array<i64: 1, 37, 16>}, {pipeline_mode = #tpu.pipeline_mode<synchronous>, transform_indices = @transform_1, window_bounds = array<i64: 9, 16, 16>}, {pipeline_mode = #tpu.pipeline_mode<synchronous>, transform_indices = @transform_2, window_bounds = array<i64: 1, 16>}, {transform_indices = @transform_3, window_bounds = array<i64: 1, 21, 16>}]} {
    %cst = arith.constant 0.000000e+00 : f32
    %0 = vector.broadcast %cst : f32 to vector<21x16xf32>
    %c0 = arith.constant 0 : index
    %c0_0 = arith.constant 0 : index
    %c0_1 = arith.constant 0 : index
    %1 = vector.load %arg1[%c0, %c0_0, %c0_1] : memref<1x37x16xf32, #tpu.memory_space<vmem>>, vector<1x21x16xf32>
    %2 = vector.shape_cast %1 : vector<1x21x16xf32> to vector<21x16xf32>
    %c0_2 = arith.constant 0 : index
    %c0_3 = arith.constant 0 : index
    %c0_4 = arith.constant 0 : index
    %3 = vector.load %arg2[%c0_2, %c0_3, %c0_4] : memref<9x16x16xf32, #tpu.memory_space<vmem>>, vector<1x16x16xf32>
    %4 = vector.shape_cast %3 : vector<1x16x16xf32> to vector<16x16xf32>
    %cst_5 = arith.constant dense<0.000000e+00> : vector<21x16xf32>
    %5 = tpu.matmul %2, %4, %cst_5 {dimension_numbers = #tpu.dot_dimension_numbers<[1], [0], [0], [1], [0, 0, 1, 1], [], []>} : vector<21x16xf32>, vector<16x16xf32>, vector<21x16xf32> -> vector<21x16xf32>
    %6 = arith.addf %0, %5 : vector<21x16xf32>
    %c0_6 = arith.constant 0 : index
    %c1 = arith.constant 1 : index
    %c0_7 = arith.constant 0 : index
    %7 = vector.load %arg1[%c0_6, %c1, %c0_7] : memref<1x37x16xf32, #tpu.memory_space<vmem>>, vector<1x21x16xf32>
    %8 = vector.shape_cast %7 : vector<1x21x16xf32> to vector<21x16xf32>
    %c1_8 = arith.constant 1 : index
    %c0_9 = arith.constant 0 : index
    %c0_10 = arith.constant 0 : index
    %9 = vector.load %arg2[%c1_8, %c0_9, %c0_10] : memref<9x16x16xf32, #tpu.memory_space<vmem>>, vector<1x16x16xf32>
    %10 = vector.shape_cast %9 : vector<1x16x16xf32> to vector<16x16xf32>
    %cst_11 = arith.constant dense<0.000000e+00> : vector<21x16xf32>
    %11 = tpu.matmul %8, %10, %cst_11 {dimension_numbers = #tpu.dot_dimension_numbers<[1], [0], [0], [1], [0, 0, 1, 1], [], []>} : vector<21x16xf32>, vector<16x16xf32>, vector<21x16xf32> -> vector<21x16xf32>
    %12 = arith.addf %6, %11 : vector<21x16xf32>
    %c0_12 = arith.constant 0 : index
    %c2 = arith.constant 2 : index
    %c0_13 = arith.constant 0 : index
    %13 = vector.load %arg1[%c0_12, %c2, %c0_13] : memref<1x37x16xf32, #tpu.memory_space<vmem>>, vector<1x21x16xf32>
    %14 = vector.shape_cast %13 : vector<1x21x16xf32> to vector<21x16xf32>
    %c2_14 = arith.constant 2 : index
    %c0_15 = arith.constant 0 : index
    %c0_16 = arith.constant 0 : index
    %15 = vector.load %arg2[%c2_14, %c0_15, %c0_16] : memref<9x16x16xf32, #tpu.memory_space<vmem>>, vector<1x16x16xf32>
    %16 = vector.shape_cast %15 : vector<1x16x16xf32> to vector<16x16xf32>
    %cst_17 = arith.constant dense<0.000000e+00> : vector<21x16xf32>
    %17 = tpu.matmul %14, %16, %cst_17 {dimension_numbers = #tpu.dot_dimension_numbers<[1], [0], [0], [1], [0, 0, 1, 1], [], []>} : vector<21x16xf32>, vector<16x16xf32>, vector<21x16xf32> -> vector<21x16xf32>
    %18 = arith.addf %12, %17 : vector<21x16xf32>
    %c0_18 = arith.constant 0 : index
    %c7 = arith.constant 7 : index
    %c0_19 = arith.constant 0 : index
    %19 = vector.load %arg1[%c0_18, %c7, %c0_19] : memref<1x37x16xf32, #tpu.memory_space<vmem>>, vector<1x21x16xf32>
    %20 = vector.shape_cast %19 : vector<1x21x16xf32> to vector<21x16xf32>
    %c3 = arith.constant 3 : index
    %c0_20 = arith.constant 0 : index
    %c0_21 = arith.constant 0 : index
    %21 = vector.load %arg2[%c3, %c0_20, %c0_21] : memref<9x16x16xf32, #tpu.memory_space<vmem>>, vector<1x16x16xf32>
    %22 = vector.shape_cast %21 : vector<1x16x16xf32> to vector<16x16xf32>
    %cst_22 = arith.constant dense<0.000000e+00> : vector<21x16xf32>
    %23 = tpu.matmul %20, %22, %cst_22 {dimension_numbers = #tpu.dot_dimension_numbers<[1], [0], [0], [1], [0, 0, 1, 1], [], []>} : vector<21x16xf32>, vector<16x16xf32>, vector<21x16xf32> -> vector<21x16xf32>
    %24 = arith.addf %18, %23 : vector<21x16xf32>
    %c0_23 = arith.constant 0 : index
    %c8 = arith.constant 8 : index
    %c0_24 = arith.constant 0 : index
    %25 = vector.load %arg1[%c0_23, %c8, %c0_24] : memref<1x37x16xf32, #tpu.memory_space<vmem>>, vector<1x21x16xf32>
    %26 = vector.shape_cast %25 : vector<1x21x16xf32> to vector<21x16xf32>
    %c4 = arith.constant 4 : index
    %c0_25 = arith.constant 0 : index
    %c0_26 = arith.constant 0 : index
    %27 = vector.load %arg2[%c4, %c0_25, %c0_26] : memref<9x16x16xf32, #tpu.memory_space<vmem>>, vector<1x16x16xf32>
    %28 = vector.shape_cast %27 : vector<1x16x16xf32> to vector<16x16xf32>
    %cst_27 = arith.constant dense<0.000000e+00> : vector<21x16xf32>
    %29 = tpu.matmul %26, %28, %cst_27 {dimension_numbers = #tpu.dot_dimension_numbers<[1], [0], [0], [1], [0, 0, 1, 1], [], []>} : vector<21x16xf32>, vector<16x16xf32>, vector<21x16xf32> -> vector<21x16xf32>
    %30 = arith.addf %24, %29 : vector<21x16xf32>
    %c0_28 = arith.constant 0 : index
    %c9 = arith.constant 9 : index
    %c0_29 = arith.constant 0 : index
    %31 = vector.load %arg1[%c0_28, %c9, %c0_29] : memref<1x37x16xf32, #tpu.memory_space<vmem>>, vector<1x21x16xf32>
    %32 = vector.shape_cast %31 : vector<1x21x16xf32> to vector<21x16xf32>
    %c5 = arith.constant 5 : index
    %c0_30 = arith.constant 0 : index
    %c0_31 = arith.constant 0 : index
    %33 = vector.load %arg2[%c5, %c0_30, %c0_31] : memref<9x16x16xf32, #tpu.memory_space<vmem>>, vector<1x16x16xf32>
    %34 = vector.shape_cast %33 : vector<1x16x16xf32> to vector<16x16xf32>
    %cst_32 = arith.constant dense<0.000000e+00> : vector<21x16xf32>
    %35 = tpu.matmul %32, %34, %cst_32 {dimension_numbers = #tpu.dot_dimension_numbers<[1], [0], [0], [1], [0, 0, 1, 1], [], []>} : vector<21x16xf32>, vector<16x16xf32>, vector<21x16xf32> -> vector<21x16xf32>
    %36 = arith.addf %30, %35 : vector<21x16xf32>
    %c0_33 = arith.constant 0 : index
    %c14 = arith.constant 14 : index
    %c0_34 = arith.constant 0 : index
    %37 = vector.load %arg1[%c0_33, %c14, %c0_34] : memref<1x37x16xf32, #tpu.memory_space<vmem>>, vector<1x21x16xf32>
    %38 = vector.shape_cast %37 : vector<1x21x16xf32> to vector<21x16xf32>
    %c6 = arith.constant 6 : index
    %c0_35 = arith.constant 0 : index
    %c0_36 = arith.constant 0 : index
    %39 = vector.load %arg2[%c6, %c0_35, %c0_36] : memref<9x16x16xf32, #tpu.memory_space<vmem>>, vector<1x16x16xf32>
    %40 = vector.shape_cast %39 : vector<1x16x16xf32> to vector<16x16xf32>
    %cst_37 = arith.constant dense<0.000000e+00> : vector<21x16xf32>
    %41 = tpu.matmul %38, %40, %cst_37 {dimension_numbers = #tpu.dot_dimension_numbers<[1], [0], [0], [1], [0, 0, 1, 1], [], []>} : vector<21x16xf32>, vector<16x16xf32>, vector<21x16xf32> -> vector<21x16xf32>
    %42 = arith.addf %36, %41 : vector<21x16xf32>
    %c0_38 = arith.constant 0 : index
    %c15 = arith.constant 15 : index
    %c0_39 = arith.constant 0 : index
    %43 = vector.load %arg1[%c0_38, %c15, %c0_39] : memref<1x37x16xf32, #tpu.memory_space<vmem>>, vector<1x21x16xf32>
    %44 = vector.shape_cast %43 : vector<1x21x16xf32> to vector<21x16xf32>
    %c7_40 = arith.constant 7 : index
    %c0_41 = arith.constant 0 : index
    %c0_42 = arith.constant 0 : index
    %45 = vector.load %arg2[%c7_40, %c0_41, %c0_42] : memref<9x16x16xf32, #tpu.memory_space<vmem>>, vector<1x16x16xf32>
    %46 = vector.shape_cast %45 : vector<1x16x16xf32> to vector<16x16xf32>
    %cst_43 = arith.constant dense<0.000000e+00> : vector<21x16xf32>
    %47 = tpu.matmul %44, %46, %cst_43 {dimension_numbers = #tpu.dot_dimension_numbers<[1], [0], [0], [1], [0, 0, 1, 1], [], []>} : vector<21x16xf32>, vector<16x16xf32>, vector<21x16xf32> -> vector<21x16xf32>
    %48 = arith.addf %42, %47 : vector<21x16xf32>
    %c0_44 = arith.constant 0 : index
    %c16 = arith.constant 16 : index
    %c0_45 = arith.constant 0 : index
    %49 = vector.load %arg1[%c0_44, %c16, %c0_45] : memref<1x37x16xf32, #tpu.memory_space<vmem>>, vector<1x21x16xf32>
    %50 = vector.shape_cast %49 : vector<1x21x16xf32> to vector<21x16xf32>
    %c8_46 = arith.constant 8 : index
    %c0_47 = arith.constant 0 : index
    %c0_48 = arith.constant 0 : index
    %51 = vector.load %arg2[%c8_46, %c0_47, %c0_48] : memref<9x16x16xf32, #tpu.memory_space<vmem>>, vector<1x16x16xf32>
    %52 = vector.shape_cast %51 : vector<1x16x16xf32> to vector<16x16xf32>
    %cst_49 = arith.constant dense<0.000000e+00> : vector<21x16xf32>
    %53 = tpu.matmul %50, %52, %cst_49 {dimension_numbers = #tpu.dot_dimension_numbers<[1], [0], [0], [1], [0, 0, 1, 1], [], []>} : vector<21x16xf32>, vector<16x16xf32>, vector<21x16xf32> -> vector<21x16xf32>
    %54 = arith.addf %48, %53 : vector<21x16xf32>
    %c0_50 = arith.constant 0 : index
    %c0_51 = arith.constant 0 : index
    %55 = vector.load %arg3[%c0_50, %c0_51] : memref<1x16xf32, #tpu.memory_space<vmem>>, vector<1x16xf32>
    %56 = vector.broadcast %55 : vector<1x16xf32> to vector<21x16xf32>
    %57 = arith.addf %54, %56 : vector<21x16xf32>
    %cst_52 = arith.constant 0.000000e+00 : f32
    %58 = vector.broadcast %cst_52 : f32 to vector<21x16xf32>
    %59 = arith.maximumf %57, %58 : vector<21x16xf32>
    %c0_53 = arith.constant 0 : index
    %c0_54 = arith.constant 0 : index
    %c0_55 = arith.constant 0 : index
    %60 = vector.load %arg4[%c0_53, %c0_54, %c0_55] : memref<1x21x16xf32, #tpu.memory_space<vmem>>, vector<1x21x16xf32>
    %61 = vector.shape_cast %60 : vector<1x21x16xf32> to vector<21x16xf32>
    %62 = vector.shape_cast %59 : vector<21x16xf32> to vector<1x21x16xf32>
    tpu.vector_store %arg4[%c0_53, %c0_54, %c0_55], %62 {strides = array<i32>} : memref<1x21x16xf32, #tpu.memory_space<vmem>>, vector<1x21x16xf32>,
    return
  }
  func.func @transform_0(%arg0: i32) -> (i32, i32, i32) {
    %c0_i32 = arith.constant 0 : i32
    %c0_i32_0 = arith.constant 0 : i32
    %c0_i32_1 = arith.constant 0 : i32
    return %arg0, %c0_i32, %c0_i32_0 : i32, i32, i32
  }
  func.func @transform_1(%arg0: i32) -> (i32, i32, i32) {
    %c0_i32 = arith.constant 0 : i32
    %c0_i32_0 = arith.constant 0 : i32
    %c0_i32_1 = arith.constant 0 : i32
    %c0_i32_2 = arith.constant 0 : i32
    return %c0_i32, %c0_i32_0, %c0_i32_1 : i32, i32, i32
  }
  func.func @transform_2(%arg0: i32) -> (i32, i32) {
    %c0_i32 = arith.constant 0 : i32
    %c0_i32_0 = arith.constant 0 : i32
    %c0_i32_1 = arith.constant 0 : i32
    return %c0_i32, %c0_i32_0 : i32, i32
  }
  func.func @transform_3(%arg0: i32) -> (i32, i32, i32) {
    %c0_i32 = arith.constant 0 : i32
    %c0_i32_0 = arith.constant 0 : i32
    %c0_i32_1 = arith.constant 0 : i32
    return %arg0, %c0_i32, %c0_i32_0 : i32, i32, i32
  }
}

module attributes {stable_mosaic.version = 11 : i64} {
  func.func @_dense_kernel(%arg0: i32, %arg1: memref<8x336xf32, #tpu.memory_space<vmem>>, %arg2: memref<336x32xf32, #tpu.memory_space<vmem>>, %arg3: memref<1x32xf32, #tpu.memory_space<vmem>>, %arg4: memref<8x32xf32, #tpu.memory_space<vmem>>) attributes {dimension_semantics = [#tpu.dimension_semantics<parallel>], iteration_bounds = array<i64: 1>, scalar_prefetch = 0 : i64, scratch_operands = 0 : i64, tpu.core_type = #tpu.core_type<tc>, window_params = [{transform_indices = @transform_0, window_bounds = array<i64: 8, 336>}, {pipeline_mode = #tpu.pipeline_mode<synchronous>, transform_indices = @transform_1, window_bounds = array<i64: 336, 32>}, {pipeline_mode = #tpu.pipeline_mode<synchronous>, transform_indices = @transform_2, window_bounds = array<i64: 1, 32>}, {transform_indices = @transform_3, window_bounds = array<i64: 8, 32>}]} {
    %c0 = arith.constant 0 : index
    %c0_0 = arith.constant 0 : index
    %0 = vector.load %arg1[%c0, %c0_0] : memref<8x336xf32, #tpu.memory_space<vmem>>, vector<8x336xf32>
    %c0_1 = arith.constant 0 : index
    %c0_2 = arith.constant 0 : index
    %1 = vector.load %arg2[%c0_1, %c0_2] : memref<336x32xf32, #tpu.memory_space<vmem>>, vector<336x32xf32>
    %cst = arith.constant dense<0.000000e+00> : vector<8x32xf32>
    %2 = tpu.matmul %0, %1, %cst {dimension_numbers = #tpu.dot_dimension_numbers<[1], [0], [0], [1], [0, 0, 1, 1], [], []>} : vector<8x336xf32>, vector<336x32xf32>, vector<8x32xf32> -> vector<8x32xf32>
    %c0_3 = arith.constant 0 : index
    %c0_4 = arith.constant 0 : index
    %3 = vector.load %arg3[%c0_3, %c0_4] : memref<1x32xf32, #tpu.memory_space<vmem>>, vector<1x32xf32>
    %4 = vector.broadcast %3 : vector<1x32xf32> to vector<8x32xf32>
    %5 = arith.addf %2, %4 : vector<8x32xf32>
    %c0_5 = arith.constant 0 : index
    %c0_6 = arith.constant 0 : index
    %6 = vector.load %arg4[%c0_5, %c0_6] : memref<8x32xf32, #tpu.memory_space<vmem>>, vector<8x32xf32>
    tpu.vector_store %arg4[%c0_5, %c0_6], %5 {strides = array<i32>} : memref<8x32xf32, #tpu.memory_space<vmem>>, vector<8x32xf32>,
    return
  }
  func.func @transform_0(%arg0: i32) -> (i32, i32) {
    %c0_i32 = arith.constant 0 : i32
    %c0_i32_0 = arith.constant 0 : i32
    return %arg0, %c0_i32 : i32, i32
  }
  func.func @transform_1(%arg0: i32) -> (i32, i32) {
    %c0_i32 = arith.constant 0 : i32
    %c0_i32_0 = arith.constant 0 : i32
    %c0_i32_1 = arith.constant 0 : i32
    return %c0_i32, %c0_i32_0 : i32, i32
  }
  func.func @transform_2(%arg0: i32) -> (i32, i32) {
    %c0_i32 = arith.constant 0 : i32
    %c0_i32_0 = arith.constant 0 : i32
    %c0_i32_1 = arith.constant 0 : i32
    return %c0_i32, %c0_i32_0 : i32, i32
  }
  func.func @transform_3(%arg0: i32) -> (i32, i32) {
    %c0_i32 = arith.constant 0 : i32
    %c0_i32_0 = arith.constant 0 : i32
    return %arg0, %c0_i32 : i32, i32
  }
}

</mosaic_0001>

<bundles_post_ra>
// kernel: _forward_impl.4
= control target key start
LH: loop header
LB: loop body
LE: loop exit
PB: predicated region body
PF: predicated region fallthrough
CT: control target
= control target key end

     0   :  { %s1923_s12 = smov 0   ;;  %s2268_s0 = inlined_call_operand.vmem [shape: f32[2,170,64], index: 0, kind: input, shape index: {}]   ;;  %s2269_s1 = inlined_call_operand.vmem [shape: f32[4,64,8], index: 1, kind: input, shape index: {}]   ;;  %s2270_s2 = inlined_call_operand.vmem [shape: f32[1,8], index: 2, kind: input, shape index: {}]   ;;  %s2271_s3 = inlined_call_operand.vmem [shape: f32[2,156,8], index: 3, kind: output, shape index: {}]  }
   0x1 LB: > { %s1351_s13 = sadd.s32 4294967295, %s1901_s12   ;;  %p1355_p0 = scmp.ge.s32.totalorder %s1901_s12, 1  ;;  %s1901_s12 = sphi %s1923_s12, %s13_s12  }
   0x2   : > { %p137_p1 = scmp.lt.s32.totalorder %s1901_s12, 3 }
   0x4   : > { %p138_p2 = pnand %p1355_p0, %p137_p1 }
   0x5   : > { %v1358_v0 = vld [vmem:[%s2269_s1 + $0x40] sm:$0xff] (!%p138_p2)  ;;  %v1359_v1 = vld [vmem:[%s2269_s1 + $0x48] sm:$0xff] (!%p138_p2)  ;;  %p161_p3 = scmp.lt.s32.totalorder (!%p138_p2), %s1351_s13, 1  ;;  %v1360_v5 = vld [vmem:[%s2269_s1 + $0x50] sm:$0xff] (!%p138_p2)  ;;  %vm228_vm0 = vcmask (!%p138_p2), 523264   ;;  %vm1274_vm1 = vcmask (!%p138_p2), 64512  }
   0x6   : > { %141 = sbr.rel (%p138_p2) target bundleno = 322 (0x142), region = 32  ;;  %v1406_v2 = vld [vmem:[%s2269_s1 + $0x80] sm:$0xff] (!%p138_p2)  ;;  %v1761_v3 = vpack.c.bf16 (!%p138_p2), %v1359_v1, %v1358_v0  ;;  %v1407_v4 = vld [vmem:[%s2269_s1 + $0x88] sm:$0xff] (!%p138_p2)  ;;  %v1361_v6 = vld [vmem:[%s2269_s1 + $0x58] sm:$0xff] (!%p138_p2)  ;;  %vm1294_vm2 = vcmask (!%p138_p2), 60416  }
   0x7   : > { %v1793_v7 = vpack.c.bf16 (!%p138_p2), %v1407_v4, %v1406_v2  ;;  %v1765_v8 = vpack.c.bf16 (!%p138_p2), %v1361_v6, %v1360_v5  ;;  %v1408_v9 = vld [vmem:[%s2269_s1 + $0x90] sm:$0xff] (!%p138_p2)  ;;  %v1409_v10 = vld [vmem:[%s2269_s1 + $0x98] sm:$0xff] (!%p138_p2)  ;;  %v1362_v11 = vld [vmem:[%s2269_s1 + $0x60] sm:$0xff] (!%p138_p2) }
   0x8   : > { %1762 = vmatprep.subr.bf16.mxu1 (!%p138_p2), %v1761_v3  ;;  %v1797_v12 = vpack.c.bf16 (!%p138_p2), %v1409_v10, %v1408_v9  ;;  %v1363_v13 = vld [vmem:[%s2269_s1 + $0x68] sm:$0xff] (!%p138_p2)  ;;  %v1410_v14 = vld [vmem:[%s2269_s1 + $0xa0] sm:$0xff] (!%p138_p2)  ;;  %v1364_v18 = vld [vmem:[%s2269_s1 + $0x70] sm:$0xff] (!%p138_p2) }
   0x9   : > { %v1411_v15 = vld [vmem:[%s2269_s1 + $0xa8] sm:$0xff] (!%p138_p2)  ;;  %1794 = vmatprep.subr.bf16.mxu0 (!%p138_p2), %v1793_v7  ;;  %1764 = vmatpush3.bf16.msra.mxu1 (!%p138_p2), %v1761_v3  ;;  %v1769_v16 = vpack.c.bf16 (!%p138_p2), %v1363_v13, %v1362_v11  ;;  %v1365_v19 = vld [vmem:[%s2269_s1 + $0x78] sm:$0xff] (!%p138_p2)  ;;  %v1412_v20 = vld [vmem:[%s2269_s1 + $0xb0] sm:$0xff] (!%p138_p2) }
   0xa   : > { %1796 = vmatpush3.bf16.msra.mxu0 (!%p138_p2), %v1793_v7  ;;  %1766 = vmatprep.subr.bf16.mxu1 (!%p138_p2), %v1765_v8  ;;  %v1801_v17 = vpack.c.bf16 (!%p138_p2), %v1411_v15, %v1410_v14  ;;  %v1413_v21 = vld [vmem:[%s2269_s1 + $0xb8] sm:$0xff] (!%p138_p2)  ;;  %v1773_v24 = vpack.c.bf16 (!%p138_p2), %v1365_v19, %v1364_v18  ;;  %v191_v26 = vld [vmem:[%s2269_s1] sm:$0xff] (!%p138_p2)  ;;  %v192_v27 = vld [vmem:[%s2269_s1 + $0x8] sm:$0xff] (!%p138_p2) }
   0xb   : > { %1798 = vmatprep.subr.bf16.mxu0 (!%p138_p2), %v1797_v12  ;;  %v1805_v25 = vpack.c.bf16 (!%p138_p2), %v1413_v21, %v1412_v20  ;;  %v1434_v28 = vld [vmem:[%s2269_s1 + $0xc0] sm:$0xff] (!%p138_p2)  ;;  %v1435_v29 = vld [vmem:[%s2269_s1 + $0xc8] sm:$0xff] (!%p138_p2)  ;;  %v1777_v30 = vpack.c.bf16 (!%p138_p2), %v192_v27, %v191_v26  ;;  %v193_v32 = vld [vmem:[%s2269_s1 + $0x10] sm:$0xff] (!%p138_p2) }
   0xc   : > { %v1809_v31 = vpack.c.bf16 (!%p138_p2), %v1435_v29, %v1434_v28  ;;  %v194_v33 = vld [vmem:[%s2269_s1 + $0x18] sm:$0xff] (!%p138_p2)  ;;  %v1436_v35 = vld [vmem:[%s2269_s1 + $0xd0] sm:$0xff] (!%p138_p2)  ;;  %v195_v42 = vld [vmem:[%s2269_s1 + $0x20] sm:$0xff] (!%p138_p2) }
   0xd   : > { %s2273_s13 = smov (!%p161_p3, %s1351_s13), 1  ;;  %1768 = vmatpush3.bf16.msra.mxu1 %v1765_v8  ;;  %v1437_v36 = vld [vmem:[%s2269_s1 + $0xd8] sm:$0xff]  ;;  %v1781_v39 = vpack.c.bf16 %v194_v33, %v193_v32  ;;  %v196_v43 = vld [vmem:[%s2269_s1 + $0x28] sm:$0xff]  ;;  %v1438_v45 = vld [vmem:[%s2269_s1 + $0xe0] sm:$0xff] }
   0xe   : > { %s1885_s11 = smul.u32 176, %s2273_s13  ;;  %1800 = vmatpush3.bf16.msra.mxu0 %v1797_v12  ;;  %1770 = vmatprep.subr.bf16.mxu1 %v1769_v16  ;;  %v1813_v41 = vpack.c.bf16 %v1437_v36, %v1436_v35  ;;  %v1439_v46 = vld [vmem:[%s2269_s1 + $0xe8] sm:$0xff]  ;;  %v1785_v50 = vpack.c.bf16 %v196_v43, %v195_v42  ;;  %v197_v52 = vld [vmem:[%s2269_s1 + $0x30] sm:$0xff]  ;;  %v198_v53 = vld [vmem:[%s2269_s1 + $0x38] sm:$0xff] }
   0xf   : > { %1802 = vmatprep.subr.bf16.mxu0 %v1801_v17  ;;  %v1817_v51 = vpack.c.bf16 %v1439_v46, %v1438_v45  ;;  %v1440_v55 = vld [vmem:[%s2269_s1 + $0xf0] sm:$0xff]  ;;  %v1441_v56 = vld [vmem:[%s2269_s1 + $0xf8] sm:$0xff]  ;;  %v1789_v60 = vpack.c.bf16 %v198_v53, %v197_v52  ;;  %s1886_s6 = smul.u32 160, %s2273_s13 }
  0x10   : > { %s1982_s22 = scalar_lea.vmem %s2268_s0, %s1885_s11  ;;  %v1821_v61 = vpack.c.bf16 %v1441_v56, %v1440_v55 }
  0x11   : > { %v199_v22 = vld [vmem:[%s1982_s22 + $0x1] sm:$0xff]  ;;  %v679_v23 = vld [vmem:[%s1982_s22 + $0xd] sm:$0xff]  ;;  %1772 = vmatpush3.bf16.msra.mxu1 %v1769_v16  ;;  %v680_v37 = vld [vmem:[%s1982_s22 + $0x15] sm:$0xff]  ;;  %s2205_s10 = scalar_lea.vmem %s2271_s3, %s1886_s6 }
  0x12   : > { %1593 = vmatprep.mubr.msk.f32.mxu1 %vm228_vm0, %v199_v22  ;;  %1685 = vmatprep.mubr.msk.f32.mxu0 %vm228_vm0, %v679_v23  ;;  %v200_v34 = vld [vmem:[%s1982_s22 + $0x9] sm:$0xff]  ;;  %v201_v38 = vld [vmem:[%s1982_s22 + $0x11] sm:$0xff]  ;;  %v681_v40 = vld [vmem:[%s1982_s22 + $0x1d] sm:$0xff] }
  0x13   : > { %1804 = vmatpush3.bf16.msra.mxu0 %v1801_v17  ;;  %1774 = vmatprep.subr.bf16.mxu1 %v1773_v24  ;;  %v202_v44 = vld [vmem:[%s1982_s22 + $0x19] sm:$0xff]  ;;  %v682_v47 = vld [vmem:[%s1982_s22 + $0x25] sm:$0xff]  ;;  %v683_v49 = vld [vmem:[%s1982_s22 + $0x2d] sm:$0xff] }
  0x14   : > { %1806 = vmatprep.subr.bf16.mxu0 %v1805_v25  ;;  %v203_v48 = vld [vmem:[%s1982_s22 + $0x21] sm:$0xff]  ;;  %v204_v54 = vld [vmem:[%s1982_s22 + $0x29] sm:$0xff]  ;;  %v684_v57 = vld [vmem:[%s1982_s22 + $0x35] sm:$0xff] }
  0x15   : > { %1776 = vmatpush3.bf16.msra.mxu1 %v1773_v24  ;;  %v205_v58 = vld [vmem:[%s1982_s22 + $0x31] sm:$0xff]  ;;  %v685_v59 = vld [vmem:[%s1982_s22 + $0x3d] sm:$0xff]  ;;  %v686_v63 = vld [vmem:[%s1982_s22 + $0x45] sm:$0xff] }
  0x16   : > { %1778 = vmatprep.subr.bf16.mxu1 %v1777_v30  ;;  %v206_v62 = vld [vmem:[%s1982_s22 + $0x39] sm:$0xff]  ;;  %v207_v0 = vld [vmem:[%s1982_s22 + $0x41] sm:$0xff]  ;;  %v687_v1 = vld [vmem:[%s1982_s22 + $0x4d] sm:$0xff] }
  0x17   : > { %1808 = vmatpush3.bf16.msra.mxu0 %v1805_v25  ;;  %v208_v2 = vld [vmem:[%s1982_s22 + $0x49] sm:$0xff]  ;;  %v688_v3 = vld [vmem:[%s1982_s22 + $0x55] sm:$0xff]  ;;  %v689_v5 = vld [vmem:[%s1982_s22 + $0x5d] sm:$0xff] }
  0x18   : > { %1810 = vmatprep.subr.bf16.mxu0 %v1809_v31  ;;  %1594 = vmatmul.mubr.msk.f32.vlgmr.msra.gmra.mrb[0].mxu1 %vm228_vm0, %v200_v34  ;;  %v209_v4 = vld [vmem:[%s1982_s22 + $0x51] sm:$0xff]  ;;  %v210_v6 = vld [vmem:[%s1982_s22 + $0x59] sm:$0xff]  ;;  %v690_v7 = vld [vmem:[%s1982_s22 + $0x65] sm:$0xff] }
  0x19   : > { %1780 = vmatpush3.bf16.msra.mxu1 %v1777_v30  ;;  %1596 = vmatprep.mubr.msk.f32.mxu1 %vm228_vm0, %v201_v38  ;;  %v211_v8 = vld [vmem:[%s1982_s22 + $0x61] sm:$0xff]  ;;  %v691_v9 = vld [vmem:[%s1982_s22 + $0x6d] sm:$0xff]  ;;  %v692_v11 = vld [vmem:[%s1982_s22 + $0x75] sm:$0xff] }
  0x1a   : > { %1686 = vmatmul.mubr.msk.f32.vlgmr.msra.gmra.mrb[0].mxu0 %vm228_vm0, %v680_v37  ;;  %1782 = vmatprep.subr.bf16.mxu1 %v1781_v39  ;;  %v212_v10 = vld [vmem:[%s1982_s22 + $0x69] sm:$0xff]  ;;  %v213_v12 = vld [vmem:[%s1982_s22 + $0x71] sm:$0xff]  ;;  %v693_v13 = vld [vmem:[%s1982_s22 + $0x7d] sm:$0xff] }
  0x1b   : > { %1812 = vmatpush3.bf16.msra.mxu0 %v1809_v31  ;;  %1688 = vmatprep.mubr.msk.f32.mxu0 %vm228_vm0, %v681_v40  ;;  %v214_v14 = vld [vmem:[%s1982_s22 + $0x79] sm:$0xff]  ;;  %v694_v15 = vld [vmem:[%s1982_s22 + $0x85] sm:$0xff]  ;;  %v695_v17 = vld [vmem:[%s1982_s22 + $0x8d] sm:$0xff] }
  0x1c   : > { %1597 = vmatmul.mubr.msk.f32.gmra.mrb[2].mxu1 %vm228_vm0, %v202_v44  ;;  %1814 = vmatprep.subr.bf16.mxu0 %v1813_v41  ;;  %v215_v16 = vld [vmem:[%s1982_s22 + $0x81] sm:$0xff]  ;;  %v216_v18 = vld [vmem:[%s1982_s22 + $0x89] sm:$0xff]  ;;  %v696_v19 = vld [vmem:[%s1982_s22 + $0x95] sm:$0xff] }
  0x1d   : > { %1599 = vmatprep.mubr.msk.f32.mxu1 %vm228_vm0, %v203_v48  ;;  %1784 = vmatpush3.bf16.msra.mxu1 %v1781_v39  ;;  %v217_v20 = vld [vmem:[%s1982_s22 + $0x91] sm:$0xff]  ;;  %v697_v21 = vld [vmem:[%s1982_s22 + $0x9d] sm:$0xff]  ;;  %v218_v22 = vld [vmem:[%s1982_s22 + $0x99] sm:$0xf] }
  0x1e   : > { %1689 = vmatmul.mubr.msk.f32.gmra.mrb[2].mxu0 %vm228_vm0, %v682_v47  ;;  %1786 = vmatprep.subr.bf16.mxu1 %v1785_v50  ;;  %v698_v23 = vld [vmem:[%s1982_s22 + $0xa5] sm:$0xf]  ;;  %v953_v25 = vld [vmem:[%s1982_s22 + $0xe] sm:$0xff]  ;;  %v954_v27 = vld [vmem:[%s1982_s22 + $0x16] sm:$0xff] }
  0x1f   : > { %1691 = vmatprep.mubr.msk.f32.mxu0 %vm228_vm0, %v683_v49  ;;  %1816 = vmatpush3.bf16.msra.mxu0 %v1813_v41  ;;  %v171_v24 = vld [vmem:[%s1982_s22] sm:$0xff]  ;;  %v172_v26 = vld [vmem:[%s1982_s22 + $0x8] sm:$0xff]  ;;  %v173_v28 = vld [vmem:[%s1982_s22 + $0x10] sm:$0xff] }
  0x20   : > { %1600 = vmatmul.mubr.msk.f32.gmra.mrb[4].mxu1 %vm228_vm0, %v204_v54  ;;  %1818 = vmatprep.subr.bf16.mxu0 %v1817_v51  ;;  %v955_v29 = vld [vmem:[%s1982_s22 + $0x1e] sm:$0xff]  ;;  %v956_v31 = vld [vmem:[%s1982_s22 + $0x26] sm:$0xff]  ;;  %v957_v33 = vld [vmem:[%s1982_s22 + $0x2e] sm:$0xff] }
  0x21   : > { %1602 = vmatprep.mubr.msk.f32.mxu1 %vm228_vm0, %v205_v58  ;;  %1788 = vmatpush3.bf16.msra.mxu1 %v1785_v50  ;;  %v174_v30 = vld [vmem:[%s1982_s22 + $0x18] sm:$0xff]  ;;  %v175_v32 = vld [vmem:[%s1982_s22 + $0x20] sm:$0xff]  ;;  %v176_v34 = vld [vmem:[%s1982_s22 + $0x28] sm:$0xff] }
  0x22   : > { %1692 = vmatmul.mubr.msk.f32.gmra.mrb[4].mxu0 %vm228_vm0, %v684_v57  ;;  %1790 = vmatprep.subr.bf16.mxu1 %v1789_v60  ;;  %v958_v35 = vld [vmem:[%s1982_s22 + $0x36] sm:$0xff]  ;;  %v959_v37 = vld [vmem:[%s1982_s22 + $0x3e] sm:$0xff]  ;;  %v960_v39 = vld [vmem:[%s1982_s22 + $0x46] sm:$0xff] }
  0x23   : > { %1694 = vmatprep.mubr.msk.f32.mxu0 %vm228_vm0, %v685_v59  ;;  %1820 = vmatpush3.bf16.msra.mxu0 %v1817_v51  ;;  %v177_v36 = vld [vmem:[%s1982_s22 + $0x30] sm:$0xff]  ;;  %v178_v38 = vld [vmem:[%s1982_s22 + $0x38] sm:$0xff]  ;;  %v179_v40 = vld [vmem:[%s1982_s22 + $0x40] sm:$0xff] }
  0x24   : > { %1603 = vmatmul.mubr.msk.f32.gmra.mrb[6].mxu1 %vm228_vm0, %v206_v62  ;;  %1822 = vmatprep.subr.bf16.mxu0 %v1821_v61  ;;  %v961_v41 = vld [vmem:[%s1982_s22 + $0x4e] sm:$0xff]  ;;  %v962_v43 = vld [vmem:[%s1982_s22 + $0x56] sm:$0xff]  ;;  %v963_v45 = vld [vmem:[%s1982_s22 + $0x5e] sm:$0xff] }
  0x25   : > { %1605 = vmatprep.mubr.msk.f32.mxu1 %vm228_vm0, %v207_v0  ;;  %1792 = vmatpush3.bf16.msra.mxu1 %v1789_v60  ;;  %v180_v42 = vld [vmem:[%s1982_s22 + $0x48] sm:$0xff]  ;;  %v181_v44 = vld [vmem:[%s1982_s22 + $0x50] sm:$0xff]  ;;  %v182_v46 = vld [vmem:[%s1982_s22 + $0x58] sm:$0xff] }
  0x26   : > { %1695 = vmatmul.mubr.msk.f32.gmra.mrb[6].mxu0 %vm228_vm0, %v686_v63  ;;  %v964_v47 = vld [vmem:[%s1982_s22 + $0x66] sm:$0xff]  ;;  %v965_v49 = vld [vmem:[%s1982_s22 + $0x6e] sm:$0xff]  ;;  %v966_v51 = vld [vmem:[%s1982_s22 + $0x76] sm:$0xff] }
  0x27   : > { %1697 = vmatprep.mubr.msk.f32.mxu0 %vm228_vm0, %v687_v1  ;;  %1824 = vmatpush3.bf16.msra.mxu0 %v1821_v61  ;;  %v183_v48 = vld [vmem:[%s1982_s22 + $0x60] sm:$0xff]  ;;  %v184_v50 = vld [vmem:[%s1982_s22 + $0x68] sm:$0xff]  ;;  %v185_v52 = vld [vmem:[%s1982_s22 + $0x70] sm:$0xff] }
  0x28   : > { %1606 = vmatmul.mubr.msk.f32.gmra.mrb[8].mxu1 %vm228_vm0, %v208_v2  ;;  %v967_v53 = vld [vmem:[%s1982_s22 + $0x7e] sm:$0xff]  ;;  %v968_v55 = vld [vmem:[%s1982_s22 + $0x86] sm:$0xff]  ;;  %v969_v57 = vld [vmem:[%s1982_s22 + $0x8e] sm:$0xff] }
  0x29   : > { %1608 = vmatprep.mubr.msk.f32.mxu1 %vm228_vm0, %v209_v4  ;;  %v186_v54 = vld [vmem:[%s1982_s22 + $0x78] sm:$0xff]  ;;  %v187_v56 = vld [vmem:[%s1982_s22 + $0x80] sm:$0xff]  ;;  %v188_v58 = vld [vmem:[%s1982_s22 + $0x88] sm:$0xff] }
  0x2a   : > { %1698 = vmatmul.mubr.msk.f32.gmra.mrb[8].mxu0 %vm228_vm0, %v688_v3  ;;  %v970_v59 = vld [vmem:[%s1982_s22 + $0x96] sm:$0xff]  ;;  %v971_v61 = vld [vmem:[%s1982_s22 + $0x9e] sm:$0xff]  ;;  %v972_v63 = vld [vmem:[%s1982_s22 + $0xa6] sm:$0xf] }
  0x2b   : > { %1700 = vmatprep.mubr.msk.f32.mxu0 %vm228_vm0, %v689_v5  ;;  %v189_v60 = vld [vmem:[%s1982_s22 + $0x90] sm:$0xff]  ;;  %v190_v62 = vld [vmem:[%s1982_s22 + $0x98] sm:$0xf]  ;;  %v2199_v2 = vld [vmem:[%s2270_s2] ss:$0 sm:$0xff] }
  0x2c   : > { %1609 = vmatmul.mubr.msk.f32.gmra.mrb[10].mxu1 %vm228_vm0, %v210_v6 }
  0x2d   : > { %1611 = vmatprep.mubr.msk.f32.mxu1 %vm228_vm0, %v211_v8 }
  0x2e   : > { %1701 = vmatmul.mubr.msk.f32.gmra.mrb[10].mxu0 %vm228_vm0, %v690_v7 }
  0x2f   : > { %1703 = vmatprep.mubr.msk.f32.mxu0 %vm228_vm0, %v691_v9 }
  0x30   : > { %1612 = vmatmul.mubr.msk.f32.gmra.mrb[12].mxu1 %vm228_vm0, %v212_v10 }
  0x31   : > { %1614 = vmatprep.mubr.msk.f32.mxu1 %vm228_vm0, %v213_v12 }
  0x32   : > { %1704 = vmatmul.mubr.msk.f32.gmra.mrb[12].mxu0 %vm228_vm0, %v692_v11 }
  0x33   : > { %1706 = vmatprep.mubr.msk.f32.mxu0 %vm228_vm0, %v693_v13 }
  0x34   : > { %1615 = vmatmul.mubr.msk.f32.gmra.mrb[14].mxu1 %vm228_vm0, %v214_v14 }
  0x35   : > { %1617 = vmatprep.mubr.msk.f32.mxu1 %vm228_vm0, %v215_v16 }
  0x36   : > { %1707 = vmatmul.mubr.msk.f32.gmra.mrb[14].mxu0 %vm228_vm0, %v694_v15 }
  0x37   : > { %1709 = vmatprep.mubr.msk.f32.mxu0 %vm228_vm0, %v695_v17 }
  0x38   : > { %1618 = vmatmul.mubr.msk.f32.gmra.mrb[16].mxu1 %vm228_vm0, %v216_v18 }
  0x39   : > { %1620 = vmatprep.mubr.msk.f32.mxu1 %vm228_vm0, %v217_v20 }
  0x3a   : > { %1710 = vmatmul.mubr.msk.f32.gmra.mrb[16].mxu0 %vm228_vm0, %v696_v19 }
  0x3b   : > { %1712 = vmatprep.mubr.msk.f32.mxu0 %vm228_vm0, %v697_v21 }
  0x3c   : > { %1621 = vmatmul.mubr.msk.f32.gmra.mrb[18].mxu1 %vm228_vm0, %v218_v22 }
  0x3d   : > { %1639 = vmatprep.mubr.msk.f32.mxu1 %vm228_vm0, %v171_v24 }
  0x3e   : > { %1713 = vmatmul.mubr.msk.f32.gmra.mrb[18].mxu0 %vm228_vm0, %v698_v23 }
  0x3f   : > { %1731 = vmatprep.mubr.msk.f32.mxu0 %vm228_vm0, %v953_v25 }
  0x40   : > { %1640 = vmatmul.mubr.msk.f32.vlgmr.msra.gmra.mrb[0].mxu1 %vm228_vm0, %v172_v26 }
  0x41   : > { %1642 = vmatprep.mubr.msk.f32.mxu1 %vm228_vm0, %v173_v28 }
  0x42   : > { %1732 = vmatmul.mubr.msk.f32.vlgmr.msra.gmra.mrb[0].mxu0 %vm228_vm0, %v954_v27 }
  0x43   : > { %1734 = vmatprep.mubr.msk.f32.mxu0 %vm228_vm0, %v955_v29 }
  0x44   : > { %1643 = vmatmul.mubr.msk.f32.gmra.mrb[2].mxu1 %vm228_vm0, %v174_v30 }
  0x45   : > { %1645 = vmatprep.mubr.msk.f32.mxu1 %vm228_vm0, %v175_v32 }
  0x46   : > { %1735 = vmatmul.mubr.msk.f32.gmra.mrb[2].mxu0 %vm228_vm0, %v956_v31 }
  0x47   : > { %1737 = vmatprep.mubr.msk.f32.mxu0 %vm228_vm0, %v957_v33 }
  0x48   : > { %1646 = vmatmul.mubr.msk.f32.gmra.mrb[4].mxu1 %vm228_vm0, %v176_v34 }
  0x49   : > { %1648 = vmatprep.mubr.msk.f32.mxu1 %vm228_vm0, %v177_v36 }
  0x4a   : > { %1738 = vmatmul.mubr.msk.f32.gmra.mrb[4].mxu0 %vm228_vm0, %v958_v35 }
  0x4b   : > { %1740 = vmatprep.mubr.msk.f32.mxu0 %vm228_vm0, %v959_v37 }
  0x4c   : > { %1649 = vmatmul.mubr.msk.f32.gmra.mrb[6].mxu1 %vm228_vm0, %v178_v38 }
  0x4d   : > { %1651 = vmatprep.mubr.msk.f32.mxu1 %vm228_vm0, %v179_v40 }
  0x4e   : > { %1741 = vmatmul.mubr.msk.f32.gmra.mrb[6].mxu0 %vm228_vm0, %v960_v39 }
  0x4f   : > { %1743 = vmatprep.mubr.msk.f32.mxu0 %vm228_vm0, %v961_v41 }
  0x50   : > { %1652 = vmatmul.mubr.msk.f32.gmra.mrb[8].mxu1 %vm228_vm0, %v180_v42 }
  0x51   : > { %1654 = vmatprep.mubr.msk.f32.mxu1 %vm228_vm0, %v181_v44 }
  0x52   : > { %1744 = vmatmul.mubr.msk.f32.gmra.mrb[8].mxu0 %vm228_vm0, %v962_v43 }
  0x53   : > { %1746 = vmatprep.mubr.msk.f32.mxu0 %vm228_vm0, %v963_v45 }
  0x54   : > { %1655 = vmatmul.mubr.msk.f32.gmra.mrb[10].mxu1 %vm228_vm0, %v182_v46 }
  0x55   : > { %1657 = vmatprep.mubr.msk.f32.mxu1 %vm228_vm0, %v183_v48 }
  0x56   : > { %1747 = vmatmul.mubr.msk.f32.gmra.mrb[10].mxu0 %vm228_vm0, %v964_v47 }
  0x57   : > { %1749 = vmatprep.mubr.msk.f32.mxu0 %vm228_vm0, %v965_v49 }
  0x58   : > { %1658 = vmatmul.mubr.msk.f32.gmra.mrb[12].mxu1 %vm228_vm0, %v184_v50 }
  0x59   : > { %1660 = vmatprep.mubr.msk.f32.mxu1 %vm228_vm0, %v185_v52 }
  0x5a   : > { %1750 = vmatmul.mubr.msk.f32.gmra.mrb[12].mxu0 %vm228_vm0, %v966_v51 }
  0x5b   : > { %1752 = vmatprep.mubr.msk.f32.mxu0 %vm228_vm0, %v967_v53 }
  0x5c   : > { %1661 = vmatmul.mubr.msk.f32.gmra.mrb[14].mxu1 %vm228_vm0, %v186_v54 }
  0x5d   : > { %1663 = vmatprep.mubr.msk.f32.mxu1 %vm228_vm0, %v187_v56 }
  0x5e   : > { %1753 = vmatmul.mubr.msk.f32.gmra.mrb[14].mxu0 %vm228_vm0, %v968_v55 }
  0x5f   : > { %1755 = vmatprep.mubr.msk.f32.mxu0 %vm228_vm0, %v969_v57 }
  0x60   : > { %1664 = vmatmul.mubr.msk.f32.gmra.mrb[16].mxu1 %vm228_vm0, %v188_v58 }
  0x61   : > { %1666 = vmatprep.mubr.msk.f32.mxu1 %vm228_vm0, %v189_v60 }
  0x62   : > { %1756 = vmatmul.mubr.msk.f32.gmra.mrb[16].mxu0 %vm228_vm0, %v970_v59 }
  0x63   : > { %1758 = vmatprep.mubr.msk.f32.mxu0 %vm228_vm0, %v971_v61 }
  0x64   : > { %1667 = vmatmul.mubr.msk.f32.gmra.mrb[18].mxu1 %vm228_vm0, %v190_v62 }
  0x66   : > { %1759 = vmatmul.mubr.msk.f32.gmra.mrb[18].mxu0 %vm228_vm0, %v972_v63 }
 0x113   : > { %v1641_v0 = vpop.f32.mrb[0].mxu1 }
 0x114   : > { %v580_v3 = vpop.f32.mrb[1].mxu1 }
 0x115   : > { %v1733_v1 = vpop.f32.mrb[0].mxu0 }
 0x116   : > { %v1825_v4 = vadd.f32 %v1733_v1, %v1641_v0  ;;  %v1108_v5 = vpop.f32.mrb[1].mxu0 }
 0x117   : > { %v1826_v6 = vadd.f32 %v1108_v5, %v580_v3  ;;  %v1644_v8 = vpop.f32.mrb[2].mxu1 }
 0x118   : > { %v1235_v7 = vadd.f32 %v1825_v4, %v2199_v2  ;;  %v590_v11 = vpop.f32.mrb[3].mxu1 }
 0x119   : > { %v1234_v9 = vadd.f32 %v1826_v6, %v2199_v2  ;;  %v1736_v10 = vpop.f32.mrb[2].mxu0 }
 0x11a   : > { %v1255_v12 = vmax.f32 %v1235_v7, 0.0  ;;  %v1827_v13 = vadd.f32 %v1736_v10, %v1644_v8  ;;  %v1118_v14 = vpop.f32.mrb[3].mxu0 }
 0x11b   : > { %v1254_v15 = vmax.f32 %v1234_v9, 0.0  ;;  %v1828_v16 = vadd.f32 %v1118_v14, %v590_v11  ;;  %v1647_v18 = vpop.f32.mrb[4].mxu1 }
 0x11c   : > { %1276 = vst.msk [vmem:[%s2205_s10 + $0x8] sm:$0xff] %vm1274_vm1, %v1255_v12  ;;  %v1237_v17 = vadd.f32 %v1827_v13, %v2199_v2  ;;  %v600_v21 = vpop.f32.mrb[5].mxu1 }
 0x11d   : > { %1275 = vst.msk [vmem:[%s2205_s10] sm:$0xff] %vm1274_vm1, %v1254_v15  ;;  %v1236_v19 = vadd.f32 %v1828_v16, %v2199_v2  ;;  %v1739_v20 = vpop.f32.mrb[4].mxu0 }
 0x11e   : > { %v1257_v22 = vmax.f32 %v1237_v17, 0.0  ;;  %v1829_v23 = vadd.f32 %v1739_v20, %v1647_v18  ;;  %v1128_v24 = vpop.f32.mrb[5].mxu0 }
 0x11f   : > { %v1256_v25 = vmax.f32 %v1236_v19, 0.0  ;;  %v1830_v26 = vadd.f32 %v1128_v24, %v600_v21  ;;  %v1650_v28 = vpop.f32.mrb[6].mxu1 }
 0x120   : > { %1278 = vst.msk [vmem:[%s2205_s10 + $0x18] sm:$0xff] %vm1274_vm1, %v1257_v22  ;;  %v1239_v27 = vadd.f32 %v1829_v23, %v2199_v2  ;;  %v610_v31 = vpop.f32.mrb[7].mxu1 }
 0x121   : > { %1277 = vst.msk [vmem:[%s2205_s10 + $0x10] sm:$0xff] %vm1274_vm1, %v1256_v25  ;;  %v1238_v29 = vadd.f32 %v1830_v26, %v2199_v2  ;;  %v1742_v30 = vpop.f32.mrb[6].mxu0 }
 0x122   : > { %v1259_v32 = vmax.f32 %v1239_v27, 0.0  ;;  %v1831_v33 = vadd.f32 %v1742_v30, %v1650_v28  ;;  %v1138_v34 = vpop.f32.mrb[7].mxu0 }
 0x123   : > { %v1258_v35 = vmax.f32 %v1238_v29, 0.0  ;;  %v1832_v36 = vadd.f32 %v1138_v34, %v610_v31  ;;  %v1653_v38 = vpop.f32.mrb[8].mxu1 }
 0x124   : > { %1280 = vst.msk [vmem:[%s2205_s10 + $0x28] sm:$0xff] %vm1274_vm1, %v1259_v32  ;;  %v1241_v37 = vadd.f32 %v1831_v33, %v2199_v2  ;;  %v620_v41 = vpop.f32.mrb[9].mxu1 }
 0x125   : > { %1279 = vst.msk [vmem:[%s2205_s10 + $0x20] sm:$0xff] %vm1274_vm1, %v1258_v35  ;;  %v1240_v39 = vadd.f32 %v1832_v36, %v2199_v2  ;;  %v1745_v40 = vpop.f32.mrb[8].mxu0 }
 0x126   : > { %v1261_v42 = vmax.f32 %v1241_v37, 0.0  ;;  %v1833_v43 = vadd.f32 %v1745_v40, %v1653_v38  ;;  %v1148_v44 = vpop.f32.mrb[9].mxu0 }
 0x127   : > { %v1260_v45 = vmax.f32 %v1240_v39, 0.0  ;;  %v1834_v46 = vadd.f32 %v1148_v44, %v620_v41  ;;  %v1656_v48 = vpop.f32.mrb[10].mxu1 }
 0x128   : > { %1282 = vst.msk [vmem:[%s2205_s10 + $0x38] sm:$0xff] %vm1274_vm1, %v1261_v42  ;;  %v1243_v47 = vadd.f32 %v1833_v43, %v2199_v2  ;;  %v630_v51 = vpop.f32.mrb[11].mxu1 }
 0x129   : > { %1281 = vst.msk [vmem:[%s2205_s10 + $0x30] sm:$0xff] %vm1274_vm1, %v1260_v45  ;;  %v1242_v49 = vadd.f32 %v1834_v46, %v2199_v2  ;;  %v1748_v50 = vpop.f32.mrb[10].mxu0 }
 0x12a   : > { %v1263_v52 = vmax.f32 %v1243_v47, 0.0  ;;  %v1835_v53 = vadd.f32 %v1748_v50, %v1656_v48  ;;  %v1158_v54 = vpop.f32.mrb[11].mxu0 }
 0x12b   : > { %v1262_v55 = vmax.f32 %v1242_v49, 0.0  ;;  %v1836_v56 = vadd.f32 %v1158_v54, %v630_v51  ;;  %v1659_v58 = vpop.f32.mrb[12].mxu1 }
 0x12c   : > { %1284 = vst.msk [vmem:[%s2205_s10 + $0x48] sm:$0xff] %vm1274_vm1, %v1263_v52  ;;  %v1245_v57 = vadd.f32 %v1835_v53, %v2199_v2  ;;  %v640_v61 = vpop.f32.mrb[13].mxu1 }
 0x12d   : > { %1283 = vst.msk [vmem:[%s2205_s10 + $0x40] sm:$0xff] %vm1274_vm1, %v1262_v55  ;;  %v1244_v59 = vadd.f32 %v1836_v56, %v2199_v2  ;;  %v1751_v60 = vpop.f32.mrb[12].mxu0 }
 0x12e   : > { %v1265_v62 = vmax.f32 %v1245_v57, 0.0  ;;  %v1837_v63 = vadd.f32 %v1751_v60, %v1659_v58  ;;  %v1168_v0 = vpop.f32.mrb[13].mxu0 }
 0x12f   : > { %v1264_v1 = vmax.f32 %v1244_v59, 0.0  ;;  %v1838_v3 = vadd.f32 %v1168_v0, %v640_v61  ;;  %v1662_v5 = vpop.f32.mrb[14].mxu1 }
 0x130   : > { %1286 = vst.msk [vmem:[%s2205_s10 + $0x58] sm:$0xff] %vm1274_vm1, %v1265_v62  ;;  %v1247_v4 = vadd.f32 %v1837_v63, %v2199_v2  ;;  %v650_v8 = vpop.f32.mrb[15].mxu1 }
 0x131   : > { %1285 = vst.msk [vmem:[%s2205_s10 + $0x50] sm:$0xff] %vm1274_vm1, %v1264_v1  ;;  %v1246_v6 = vadd.f32 %v1838_v3, %v2199_v2  ;;  %v1754_v7 = vpop.f32.mrb[14].mxu0 }
 0x132   : > { %v1267_v9 = vmax.f32 %v1247_v4, 0.0  ;;  %v1839_v10 = vadd.f32 %v1754_v7, %v1662_v5  ;;  %v1178_v11 = vpop.f32.mrb[15].mxu0 }
 0x133   : > { %v1266_v12 = vmax.f32 %v1246_v6, 0.0  ;;  %v1840_v13 = vadd.f32 %v1178_v11, %v650_v8  ;;  %v1665_v15 = vpop.f32.mrb[16].mxu1 }
 0x134   : > { %1288 = vst.msk [vmem:[%s2205_s10 + $0x68] sm:$0xff] %vm1274_vm1, %v1267_v9  ;;  %v1249_v14 = vadd.f32 %v1839_v10, %v2199_v2  ;;  %v660_v18 = vpop.f32.mrb[17].mxu1 }
 0x135   : > { %1287 = vst.msk [vmem:[%s2205_s10 + $0x60] sm:$0xff] %vm1274_vm1, %v1266_v12  ;;  %v1248_v16 = vadd.f32 %v1840_v13, %v2199_v2  ;;  %v1757_v17 = vpop.f32.mrb[16].mxu0 }
 0x136   : > { %v1269_v19 = vmax.f32 %v1249_v14, 0.0  ;;  %v1841_v20 = vadd.f32 %v1757_v17, %v1665_v15  ;;  %v1188_v21 = vpop.f32.mrb[17].mxu0 }
 0x137   : > { %v1268_v22 = vmax.f32 %v1248_v16, 0.0  ;;  %v1842_v23 = vadd.f32 %v1188_v21, %v660_v18  ;;  %v1668_v25 = vpop.f32.mrb[18].mxu1 }
 0x138   : > { %1290 = vst.msk [vmem:[%s2205_s10 + $0x78] sm:$0xff] %vm1274_vm1, %v1269_v19  ;;  %v1251_v24 = vadd.f32 %v1841_v20, %v2199_v2  ;;  %v670_v28 = vpop.f32.mrb[19].mxu1 }
 0x139   : > { %1289 = vst.msk [vmem:[%s2205_s10 + $0x70] sm:$0xff] %vm1274_vm1, %v1268_v22  ;;  %v1250_v26 = vadd.f32 %v1842_v23, %v2199_v2  ;;  %v1760_v27 = vpop.f32.mrb[18].mxu0 }
 0x13a   : > { %v1271_v29 = vmax.f32 %v1251_v24, 0.0  ;;  %v1843_v30 = vadd.f32 %v1760_v27, %v1668_v25  ;;  %v1198_v31 = vpop.f32.mrb[19].mxu0 }
 0x13b   : > { %v1270_v32 = vmax.f32 %v1250_v26, 0.0  ;;  %v1844_v33 = vadd.f32 %v1198_v31, %v670_v28 }
 0x13c   : > { %1292 = vst.msk [vmem:[%s2205_s10 + $0x88] sm:$0xff] %vm1274_vm1, %v1271_v29  ;;  %v1253_v34 = vadd.f32 %v1843_v30, %v2199_v2 }
 0x13d   : > { %1291 = vst.msk [vmem:[%s2205_s10 + $0x80] sm:$0xff] %vm1274_vm1, %v1270_v32  ;;  %v1252_v35 = vadd.f32 %v1844_v33, %v2199_v2 }
 0x13e   : > { %v1273_v36 = vmax.f32 %v1253_v34, 0.0 }
 0x13f   : > { %v1272_v37 = vmax.f32 %v1252_v35, 0.0 }
 0x140   : > { %1295 = vst.msk [vmem:[%s2205_s10 + $0x98] sm:$0xf] %vm1294_vm2, %v1273_v36 }
 0x141   : > { %1293 = vst.msk [vmem:[%s2205_s10 + $0x90] sm:$0xff] %vm1274_vm1, %v1272_v37 }
 0x142 PF: > { %s13_s12 = sadd.s32 1, %s1901_s12  }
 0x143   : > { %p10_p4 = scmp.ge.s32.totalorder %s13_s12, 4  }
 0x145   :  { %12 = sbr.rel (!%p10_p4) target bundleno = 1 (0x1), region = 65 }

// kernel: _forward_impl.5
= control target key start
LH: loop header
LB: loop body
LE: loop exit
PB: predicated region body
PF: predicated region fallthrough
CT: control target
= control target key end

     0   :  { %s958_s12 = smov 0   ;;  %s1120_s0 = inlined_call_operand.vmem [shape: f32[2,45,32], index: 0, kind: input, shape index: {}]   ;;  %s1121_s1 = inlined_call_operand.vmem [shape: f32[4,32,16], index: 1, kind: input, shape index: {}]   ;;  %s1122_s2 = inlined_call_operand.vmem [shape: f32[1,16], index: 2, kind: input, shape index: {}]   ;;  %s1123_s3 = inlined_call_operand.vmem [shape: f32[2,37,16], index: 3, kind: output, shape index: {}]  }
   0x1 LB: > { %s720_s13 = sadd.s32 4294967295, %s933_s12   ;;  %p724_p0 = scmp.ge.s32.totalorder %s933_s12, 1  ;;  %s933_s12 = sphi %s958_s12, %s13_s12  }
   0x2   : > { %p137_p1 = scmp.lt.s32.totalorder %s933_s12, 3 }
   0x4   : > { %p138_p2 = pnand %p724_p0, %p137_p1 }
   0x5   : > { %v727_v0 = vld [vmem:[%s1121_s1 + $0x20] sm:$0xff] (!%p138_p2)  ;;  %v728_v1 = vld [vmem:[%s1121_s1 + $0x28] sm:$0xff] (!%p138_p2)  ;;  %v935_v3 = vmov (!%p138_p2), 0.0|0.0   ;;  %v729_v6 = vld [vmem:[%s1121_s1 + $0x30] sm:$0xff] (!%p138_p2)  ;;  %p161_p3 = scmp.lt.s32.totalorder (!%p138_p2), %s720_s13, 1  ;;  %vm936_vm0 = vmmov (!%p138_p2), 0  }
   0x6   : > { %141 = sbr.rel (%p138_p2) target bundleno = 275 (0x113), region = 32  ;;  %v176_v2 = vld [vmem:[%s1121_s1] sm:$0xff] (!%p138_p2)  ;;  %890 = vmatprep.subr.bf16.mxu0 (!%p138_p2), %v935_v3  ;;  %v891_v4 = vpack.c.bf16 (!%p138_p2), %v728_v1, %v727_v0  ;;  %896 = vmatprep.subr.bf16.mxu1 (!%p138_p2), %v935_v3  ;;  %v177_v5 = vld [vmem:[%s1121_s1 + $0x8] sm:$0xff] (!%p138_p2)  ;;  %v730_v7 = vld [vmem:[%s1121_s1 + $0x38] sm:$0xff] (!%p138_p2)  ;;  %v937_v11 = vmov (!%p138_p2), 0.0   ;;  %vm190_vm1 = vcmask (!%p138_p2), 261120  }
   0x7   : > { %v897_v8 = vpack.c.bf16 (!%p138_p2), %v177_v5, %v176_v2  ;;  %v178_v9 = vld [vmem:[%s1121_s1 + $0x10] sm:$0xff] (!%p138_p2)  ;;  %v179_v10 = vld [vmem:[%s1121_s1 + $0x18] sm:$0xff] (!%p138_p2)  ;;  %806 = vmatprep.mubr.msk.f32.mxu0 (!%p138_p2), %vm936_vm0, %v937_v11  ;;  %829 = vmatprep.mubr.msk.f32.mxu1 (!%p138_p2), %vm936_vm0, %v937_v11  ;;  %v894_v12 = vpack.c.bf16 (!%p138_p2), %v730_v7, %v729_v6  ;;  %v741_v14 = vld [vmem:[%s1121_s1 + $0x40] sm:$0xff] (!%p138_p2)  ;;  %vm658_vm2 = vcmask (!%p138_p2), 130048   ;;  %vm663_vm3 = vcmask (!%p138_p2), 126976  }
   0x8   : > { %892 = vmatpush3.bf16.msra.mxu0 (!%p138_p2), %v891_v4  ;;  %v900_v13 = vpack.c.bf16 (!%p138_p2), %v179_v10, %v178_v9  ;;  %v742_v15 = vld [vmem:[%s1121_s1 + $0x48] sm:$0xff] (!%p138_p2)  ;;  %v750_v16 = vld [vmem:[%s1121_s1 + $0x60] sm:$0xff] (!%p138_p2)  ;;  %v743_v22 = vld [vmem:[%s1121_s1 + $0x50] sm:$0xff] (!%p138_p2) }
   0x9   : > { %898 = vmatpush3.bf16.msra.mxu1 (!%p138_p2), %v897_v8  ;;  %893 = vmatprep.subr.bf16.mxu0 (!%p138_p2), %v935_v3  ;;  %v751_v17 = vld [vmem:[%s1121_s1 + $0x68] sm:$0xff] (!%p138_p2)  ;;  %v903_v18 = vpack.c.bf16 (!%p138_p2), %v742_v15, %v741_v14  ;;  %v744_v23 = vld [vmem:[%s1121_s1 + $0x58] sm:$0xff] (!%p138_p2)  ;;  %v752_v24 = vld [vmem:[%s1121_s1 + $0x70] sm:$0xff] (!%p138_p2) }
   0xa   : > { %899 = vmatprep.subr.bf16.mxu1 (!%p138_p2), %v935_v3  ;;  %v909_v21 = vpack.c.bf16 (!%p138_p2), %v751_v17, %v750_v16  ;;  %v753_v25 = vld [vmem:[%s1121_s1 + $0x78] sm:$0xff] (!%p138_p2)  ;;  %v906_v28 = vpack.c.bf16 (!%p138_p2), %v744_v23, %v743_v22  ;;  %v759_v8 = vld [vmem:[%s1122_s2] ss:$0 sm:$0xff] (!%p138_p2) }
   0xb   : > { %v912_v29 = vpack.c.bf16 (!%p138_p2), %v753_v25, %v752_v24 }
   0xc   : > { %895 = vmatpush3.bf16.msra.mxu0 (!%p138_p2), %v894_v12 }
   0xd   : > { %s1125_s13 = smov (!%p161_p3, %s720_s13), 1  ;;  %901 = vmatpush3.bf16.msra.mxu1 %v900_v13  ;;  %902 = vmatprep.subr.bf16.mxu0 %v935_v3 }
   0xe   : > { %s914_s7 = smul.u32 48, %s1125_s13  ;;  %908 = vmatprep.subr.bf16.mxu1 %v935_v3 }
   0xf   : > { %s915_s25 = smul.u32 40, %s1125_s13 }
  0x10   : > { %s1012_s16 = scalar_lea.vmem %s1120_s0, %s914_s7 }
  0x11   : > { %v180_v19 = vld [vmem:[%s1012_s16 + $0x1] sm:$0xff]  ;;  %v181_v26 = vld [vmem:[%s1012_s16 + $0x9] sm:$0xff]  ;;  %v182_v30 = vld [vmem:[%s1012_s16 + $0x11] sm:$0xff]  ;;  %s1106_s30 = scalar_lea.vmem %s1123_s3, %s915_s25 }
  0x12   : > { %v171_v20 = vld [vmem:[%s1012_s16] sm:$0xff]  ;;  %807 = vmatmul.mubr.msk.f32.vlgmr.msra.gmra.mrb[0].mxu0 %vm190_vm1, %v180_v19  ;;  %v172_v27 = vld [vmem:[%s1012_s16 + $0x8] sm:$0xff]  ;;  %v173_v31 = vld [vmem:[%s1012_s16 + $0x10] sm:$0xff] }
  0x13   : > { %830 = vmatmul.mubr.msk.f32.vlgmr.msra.gmra.mrb[0].mxu1 %vm190_vm1, %v171_v20  ;;  %904 = vmatpush3.bf16.msra.mxu0 %v903_v18  ;;  %v183_v32 = vld [vmem:[%s1012_s16 + $0x19] sm:$0xff]  ;;  %v184_v34 = vld [vmem:[%s1012_s16 + $0x21] sm:$0x1f]  ;;  %v401_v36 = vld [vmem:[%s1012_s16 + $0x7] sm:$0xff] }
  0x14   : > { %809 = vmatprep.mubr.msk.f32.mxu0 %vm936_vm0, %v937_v11  ;;  %910 = vmatpush3.bf16.msra.mxu1 %v909_v21  ;;  %v174_v33 = vld [vmem:[%s1012_s16 + $0x18] sm:$0xff]  ;;  %v175_v35 = vld [vmem:[%s1012_s16 + $0x20] sm:$0x1f]  ;;  %v402_v37 = vld [vmem:[%s1012_s16 + $0xf] sm:$0xff] }
  0x15   : > { %832 = vmatprep.mubr.msk.f32.mxu1 %vm936_vm0, %v937_v11  ;;  %905 = vmatprep.subr.bf16.mxu0 %v935_v3  ;;  %v403_v38 = vld [vmem:[%s1012_s16 + $0x17] sm:$0xff]  ;;  %v404_v39 = vld [vmem:[%s1012_s16 + $0x1f] sm:$0xff]  ;;  %v405_v41 = vld [vmem:[%s1012_s16 + $0x27] sm:$0x1f] }
  0x16   : > { %810 = vmatmul.mubr.msk.f32.gmra.mrb[2].mxu0 %vm190_vm1, %v181_v26  ;;  %911 = vmatprep.subr.bf16.mxu1 %v935_v3  ;;  %v524_v40 = vld [vmem:[%s1012_s16 + $0x20] sm:$0xff]  ;;  %v525_v42 = vld [vmem:[%s1012_s16 + $0x28] sm:$0x1f] }
  0x17   : > { %833 = vmatmul.mubr.msk.f32.gmra.mrb[2].mxu1 %vm190_vm1, %v172_v27  ;;  %812 = vmatprep.mubr.msk.f32.mxu0 %vm936_vm0, %v937_v11 }
  0x18   : > { %835 = vmatprep.mubr.msk.f32.mxu1 %vm936_vm0, %v937_v11  ;;  %907 = vmatpush3.bf16.msra.mxu0 %v906_v28 }
  0x19   : > { %913 = vmatpush3.bf16.msra.mxu1 %v912_v29 }
  0x1a   : > { %813 = vmatmul.mubr.msk.f32.gmra.mrb[4].mxu0 %vm190_vm1, %v182_v30 }
  0x1b   : > { %836 = vmatmul.mubr.msk.f32.gmra.mrb[4].mxu1 %vm190_vm1, %v173_v31  ;;  %815 = vmatprep.mubr.msk.f32.mxu0 %vm936_vm0, %v937_v11 }
  0x1c   : > { %838 = vmatprep.mubr.msk.f32.mxu1 %vm936_vm0, %v937_v11 }
  0x1e   : > { %816 = vmatmul.mubr.msk.f32.gmra.mrb[6].mxu0 %vm190_vm1, %v183_v32 }
  0x1f   : > { %839 = vmatmul.mubr.msk.f32.gmra.mrb[6].mxu1 %vm190_vm1, %v174_v33  ;;  %818 = vmatprep.mubr.msk.f32.mxu0 %vm936_vm0, %v937_v11 }
  0x20   : > { %841 = vmatprep.mubr.msk.f32.mxu1 %vm936_vm0, %v937_v11 }
  0x22   : > { %819 = vmatmul.mubr.msk.f32.gmra.mrb[8].mxu0 %vm190_vm1, %v184_v34 }
  0x23   : > { %842 = vmatmul.mubr.msk.f32.gmra.mrb[8].mxu1 %vm190_vm1, %v175_v35  ;;  %852 = vmatprep.mubr.msk.f32.mxu0 %vm936_vm0, %v937_v11 }
  0x24   : > { %875 = vmatprep.mubr.msk.f32.mxu1 %vm936_vm0, %v937_v11 }
  0x26   : > { %853 = vmatmul.mubr.msk.f32.vlgmr.msra.gmra.mrb[10].mxu0 %vm190_vm1, %v401_v36 }
  0x27   : > { %876 = vmatmul.mubr.msk.f32.vlgmr.msra.gmra.mrb[10].mxu1 %vm190_vm1, %v172_v27  ;;  %855 = vmatprep.mubr.msk.f32.mxu0 %vm936_vm0, %v937_v11 }
  0x28   : > { %878 = vmatprep.mubr.msk.f32.mxu1 %vm936_vm0, %v937_v11 }
  0x2a   : > { %856 = vmatmul.mubr.msk.f32.gmra.mrb[12].mxu0 %vm190_vm1, %v402_v37 }
  0x2b   : > { %879 = vmatmul.mubr.msk.f32.gmra.mrb[12].mxu1 %vm190_vm1, %v173_v31  ;;  %858 = vmatprep.mubr.msk.f32.mxu0 %vm936_vm0, %v937_v11 }
  0x2c   : > { %881 = vmatprep.mubr.msk.f32.mxu1 %vm936_vm0, %v937_v11 }
  0x2e   : > { %859 = vmatmul.mubr.msk.f32.gmra.mrb[14].mxu0 %vm190_vm1, %v403_v38 }
  0x2f   : > { %882 = vmatmul.mubr.msk.f32.gmra.mrb[14].mxu1 %vm190_vm1, %v174_v33  ;;  %861 = vmatprep.mubr.msk.f32.mxu0 %vm936_vm0, %v937_v11 }
  0x30   : > { %884 = vmatprep.mubr.msk.f32.mxu1 %vm936_vm0, %v937_v11 }
  0x32   : > { %862 = vmatmul.mubr.msk.f32.gmra.mrb[16].mxu0 %vm190_vm1, %v404_v39 }
  0x33   : > { %885 = vmatmul.mubr.msk.f32.gmra.mrb[16].mxu1 %vm190_vm1, %v524_v40  ;;  %864 = vmatprep.mubr.msk.f32.mxu0 %vm936_vm0, %v937_v11 }
  0x34   : > { %887 = vmatprep.mubr.msk.f32.mxu1 %vm936_vm0, %v937_v11 }
  0x36   : > { %865 = vmatmul.mubr.msk.f32.gmra.mrb[18].mxu0 %vm190_vm1, %v405_v41 }
  0x37   : > { %888 = vmatmul.mubr.msk.f32.gmra.mrb[18].mxu1 %vm190_vm1, %v525_v42 }
  0xe5   : > { %v272_v43 = vpop.f32.mrb[0].mxu0 }
  0xe6   : > { %v808_v44 = vpop.f32.mrb[1].mxu0  ;;  %v377_v45 = vpop.f32.mrb[0].mxu1 }
  0xe7   : > { %v378_v46 = vadd.f32 %v377_v45, %v272_v43  ;;  %v831_v47 = vpop.f32.mrb[1].mxu1 }
  0xe9   : > { %v277_v48 = vpop.f32.mrb[2].mxu0 }
  0xea   : > { %v811_v49 = vpop.f32.mrb[3].mxu0  ;;  %v382_v50 = vpop.f32.mrb[2].mxu1 }
  0xeb   : > { %v383_v51 = vadd.f32 %v382_v50, %v277_v48  ;;  %v834_v52 = vpop.f32.mrb[3].mxu1 }
  0xed   : > { %v282_v53 = vpop.f32.mrb[4].mxu0 }
  0xee   : > { %v814_v54 = vpop.f32.mrb[5].mxu0  ;;  %v387_v55 = vpop.f32.mrb[4].mxu1 }
  0xef   : > { %v388_v56 = vadd.f32 %v387_v55, %v282_v53  ;;  %v837_v57 = vpop.f32.mrb[5].mxu1 }
  0xf1   : > { %v287_v58 = vpop.f32.mrb[6].mxu0 }
  0xf2   : > { %v817_v59 = vpop.f32.mrb[7].mxu0  ;;  %v392_v60 = vpop.f32.mrb[6].mxu1 }
  0xf3   : > { %v393_v61 = vadd.f32 %v392_v60, %v287_v58  ;;  %v840_v62 = vpop.f32.mrb[7].mxu1 }
  0xf5   : > { %v292_v63 = vpop.f32.mrb[8].mxu0 }
  0xf6   : > { %v820_v0 = vpop.f32.mrb[9].mxu0  ;;  %v397_v1 = vpop.f32.mrb[8].mxu1 }
  0xf7   : > { %v398_v2 = vadd.f32 %v397_v1, %v292_v63  ;;  %v843_v3 = vpop.f32.mrb[9].mxu1 }
  0xf9   : > { %v492_v4 = vpop.f32.mrb[10].mxu0 }
  0xfa   : > { %v516_v5 = vadd.f32 %v492_v4, %v378_v46  ;;  %v854_v6 = vpop.f32.mrb[11].mxu0  ;;  %v612_v7 = vpop.f32.mrb[10].mxu1 }
  0xfb   : > { %v877_v9 = vpop.f32.mrb[11].mxu1 }
  0xfc   : > { %v636_v10 = vadd.f32 %v612_v7, %v516_v5 }
  0xfd   : > { %v497_v11 = vpop.f32.mrb[12].mxu0 }
  0xfe   : > { %v648_v12 = vadd.f32 %v759_v8, %v636_v10  ;;  %v517_v13 = vadd.f32 %v497_v11, %v383_v51  ;;  %v857_v14 = vpop.f32.mrb[13].mxu0  ;;  %v617_v15 = vpop.f32.mrb[12].mxu1 }
  0xff   : > { %v880_v16 = vpop.f32.mrb[13].mxu1 }
 0x100   : > { %v653_v17 = vmax.f32 %v648_v12, 0.0  ;;  %v637_v18 = vadd.f32 %v617_v15, %v517_v13 }
 0x101   : > { %v502_v19 = vpop.f32.mrb[14].mxu0 }
 0x102   : > { %659 = vst.msk [vmem:[%s1106_s30] sm:$0xff] %vm658_vm2, %v653_v17  ;;  %v649_v20 = vadd.f32 %v759_v8, %v637_v18  ;;  %v518_v21 = vadd.f32 %v502_v19, %v388_v56  ;;  %v860_v22 = vpop.f32.mrb[15].mxu0  ;;  %v622_v23 = vpop.f32.mrb[14].mxu1 }
 0x103   : > { %v883_v24 = vpop.f32.mrb[15].mxu1 }
 0x104   : > { %v654_v25 = vmax.f32 %v649_v20, 0.0  ;;  %v638_v26 = vadd.f32 %v622_v23, %v518_v21 }
 0x105   : > { %v507_v27 = vpop.f32.mrb[16].mxu0 }
 0x106   : > { %660 = vst.msk [vmem:[%s1106_s30 + $0x8] sm:$0xff] %vm658_vm2, %v654_v25  ;;  %v650_v28 = vadd.f32 %v759_v8, %v638_v26  ;;  %v519_v29 = vadd.f32 %v507_v27, %v393_v61  ;;  %v863_v30 = vpop.f32.mrb[17].mxu0  ;;  %v627_v31 = vpop.f32.mrb[16].mxu1 }
 0x107   : > { %v886_v32 = vpop.f32.mrb[17].mxu1 }
 0x108   : > { %v655_v33 = vmax.f32 %v650_v28, 0.0  ;;  %v639_v34 = vadd.f32 %v627_v31, %v519_v29 }
 0x109   : > { %v512_v35 = vpop.f32.mrb[18].mxu0 }
 0x10a   : > { %661 = vst.msk [vmem:[%s1106_s30 + $0x10] sm:$0xff] %vm658_vm2, %v655_v33  ;;  %v651_v36 = vadd.f32 %v759_v8, %v639_v34  ;;  %v520_v37 = vadd.f32 %v512_v35, %v398_v2  ;;  %v866_v38 = vpop.f32.mrb[19].mxu0  ;;  %v632_v39 = vpop.f32.mrb[18].mxu1 }
 0x10b   : > { %v889_v40 = vpop.f32.mrb[19].mxu1 }
 0x10c   : > { %v656_v41 = vmax.f32 %v651_v36, 0.0  ;;  %v640_v42 = vadd.f32 %v632_v39, %v520_v37 }
 0x10e   : > { %662 = vst.msk [vmem:[%s1106_s30 + $0x18] sm:$0xff] %vm658_vm2, %v656_v41  ;;  %v652_v43 = vadd.f32 %v759_v8, %v640_v42 }
 0x110   : > { %v657_v44 = vmax.f32 %v652_v43, 0.0 }
 0x112   : > { %664 = vst.msk [vmem:[%s1106_s30 + $0x20] sm:$0x1f] %vm663_vm3, %v657_v44 }
 0x113 PF: > { %s13_s12 = sadd.s32 1, %s933_s12  }
 0x114   : > { %p10_p4 = scmp.ge.s32.totalorder %s13_s12, 4  }
 0x116   :  { %12 = sbr.rel (!%p10_p4) target bundleno = 1 (0x1), region = 65 }

// kernel: _forward_impl.6
= control target key start
LH: loop header
LB: loop body
LE: loop exit
PB: predicated region body
PF: predicated region fallthrough
CT: control target
= control target key end

     0   :  { %s1407_s12 = smov 0   ;;  %s1607_s0 = inlined_call_operand.vmem [shape: f32[2,37,16], index: 0, kind: input, shape index: {}]   ;;  %s1608_s1 = inlined_call_operand.vmem [shape: f32[9,16,16], index: 1, kind: input, shape index: {}]   ;;  %s1609_s2 = inlined_call_operand.vmem [shape: f32[1,16], index: 2, kind: input, shape index: {}]   ;;  %s1610_s3 = inlined_call_operand.vmem [shape: f32[2,21,16], index: 3, kind: output, shape index: {}]  }
   0x1 LB: > { %s1119_s13 = sadd.s32 4294967295, %s1382_s12   ;;  %p1123_p0 = scmp.ge.s32.totalorder %s1382_s12, 1  ;;  %s1382_s12 = sphi %s1407_s12, %s13_s12  }
   0x2   : > { %p137_p1 = scmp.lt.s32.totalorder %s1382_s12, 3 }
   0x4   : > { %p138_p2 = pnand %p1123_p0, %p137_p1 }
   0x5   : > { %v1126_v0 = vld [vmem:[%s1608_s1 + $0x10] sm:$0xff] (!%p138_p2)  ;;  %v1127_v1 = vld [vmem:[%s1608_s1 + $0x18] sm:$0xff] (!%p138_p2)  ;;  %p161_p3 = scmp.lt.s32.totalorder (!%p138_p2), %s1119_s13, 1  ;;  %v1384_v2 = vmov (!%p138_p2), 0.0|0.0   ;;  %vm1385_vm0 = vmmov (!%p138_p2), 0   ;;  %v1386_v4 = vmov (!%p138_p2), 0.0  }
   0x6   : > { %141 = sbr.rel (%p138_p2) target bundleno = 291 (0x123), region = 32  ;;  %1361 = vmatprep.subr.bf16.mxu1 (!%p138_p2), %v1384_v2  ;;  %v1335_v3 = vpack.c.bf16 (!%p138_p2), %v1127_v1, %v1126_v0  ;;  %1224 = vmatprep.mubr.msk.f32.mxu1 (!%p138_p2), %vm1385_vm0, %v1386_v4  ;;  %v174_v5 = vld [vmem:[%s1608_s1] sm:$0xff] (!%p138_p2)  ;;  %v175_v6 = vld [vmem:[%s1608_s1 + $0x8] sm:$0xff] (!%p138_p2)  ;;  %vm182_vm1 = vcmask (!%p138_p2), 130048   ;;  %v1139_v16 = vld [vmem:[%s1608_s1 + $0x30] sm:$0xff] (!%p138_p2)  ;;  %vm1062_vm2 = vcmask (!%p138_p2), 126976  }
   0x7   : > { %1334 = vmatprep.subr.bf16.mxu0 (!%p138_p2), %v1384_v2  ;;  %1221 = vmatprep.mubr.msk.f32.mxu0 (!%p138_p2), %vm1385_vm0, %v1386_v4  ;;  %v1134_v7 = vld [vmem:[%s1608_s1 + $0x20] sm:$0xff] (!%p138_p2)  ;;  %v1135_v8 = vld [vmem:[%s1608_s1 + $0x28] sm:$0xff] (!%p138_p2)  ;;  %v1338_v9 = vpack.c.bf16 (!%p138_p2), %v175_v6, %v174_v5  ;;  %v1140_v17 = vld [vmem:[%s1608_s1 + $0x38] sm:$0xff] (!%p138_p2) }
   0x8   : > { %1362 = vmatpush3.bf16.msra.mxu1 (!%p138_p2), %v1335_v3  ;;  %1336 = vmatpush3.bf16.msra.mxu0 (!%p138_p2), %v1335_v3  ;;  %v1341_v10 = vpack.c.bf16 (!%p138_p2), %v1135_v8, %v1134_v7  ;;  %v1144_v11 = vld [vmem:[%s1608_s1 + $0x40] sm:$0xff] (!%p138_p2)  ;;  %v1145_v14 = vld [vmem:[%s1608_s1 + $0x48] sm:$0xff] (!%p138_p2)  ;;  %v1344_v21 = vpack.c.bf16 (!%p138_p2), %v1140_v17, %v1139_v16  ;;  %v1149_v28 = vld [vmem:[%s1608_s1 + $0x50] sm:$0xff] (!%p138_p2) }
   0x9   : > { %1337 = vmatprep.subr.bf16.mxu1 (!%p138_p2), %v1384_v2  ;;  %1340 = vmatprep.subr.bf16.mxu0 (!%p138_p2), %v1384_v2  ;;  %v1347_v19 = vpack.c.bf16 (!%p138_p2), %v1145_v14, %v1144_v11  ;;  %v1154_v25 = vld [vmem:[%s1608_s1 + $0x60] sm:$0xff] (!%p138_p2)  ;;  %v1155_v26 = vld [vmem:[%s1608_s1 + $0x68] sm:$0xff] (!%p138_p2)  ;;  %v1150_v29 = vld [vmem:[%s1608_s1 + $0x58] sm:$0xff] (!%p138_p2) }
   0xa   : > { %v1353_v30 = vpack.c.bf16 (!%p138_p2), %v1155_v26, %v1154_v25  ;;  %v1350_v32 = vpack.c.bf16 (!%p138_p2), %v1150_v29, %v1149_v28  ;;  %v1164_v36 = vld [vmem:[%s1608_s1 + $0x80] sm:$0xff] (!%p138_p2)  ;;  %v1165_v37 = vld [vmem:[%s1608_s1 + $0x88] sm:$0xff] (!%p138_p2)  ;;  %v1159_v39 = vld [vmem:[%s1608_s1 + $0x70] sm:$0xff] (!%p138_p2) }
   0xb   : > { %v1160_v40 = vld [vmem:[%s1608_s1 + $0x78] sm:$0xff] (!%p138_p2)  ;;  %v1359_v42 = vpack.c.bf16 (!%p138_p2), %v1165_v37, %v1164_v36 }
   0xc   : > { %v1356_v43 = vpack.c.bf16 (!%p138_p2), %v1160_v40, %v1159_v39 }
   0xd   : > { %s1612_s13 = smov (!%p161_p3, %s1119_s13), 1 }
   0xe   : > { %s1363_s26 = smul.u32 40, %s1612_s13 }
  0x10   : > { %s1447_s29 = scalar_lea.vmem %s1607_s0, %s1363_s26 }
  0x11   : > { %v1453_v12 = vld [vmem:[%s1447_s29 + $0x9] sm:$0xff]  ;;  %v176_v13 = vld [vmem:[%s1447_s29 + $0x1] sm:$0xff]  ;;  %v178_v15 = vld [vmem:[%s1447_s29 + $0x11] sm:$0x1f] }
  0x12   : > { %1225 = vmatmul.mubr.msk.f32.vlgmr.msra.gmra.mrb[0].mxu1 %vm182_vm1, %v1453_v12  ;;  %1222 = vmatmul.mubr.msk.f32.vlgmr.msra.gmra.mrb[0].mxu0 %vm182_vm1, %v176_v13  ;;  %v361_v18 = vld [vmem:[%s1447_s29 + $0x2] sm:$0xff]  ;;  %v362_v22 = vld [vmem:[%s1447_s29 + $0xa] sm:$0xff]  ;;  %v363_v24 = vld [vmem:[%s1447_s29 + $0x12] sm:$0x1f] }
  0x13   : > { %1339 = vmatpush3.bf16.msra.mxu1 %v1338_v9  ;;  %1227 = vmatprep.mubr.msk.f32.mxu1 %vm1385_vm0, %v1386_v4  ;;  %v171_v20 = vld [vmem:[%s1447_s29] sm:$0xff]  ;;  %v172_v23 = vld [vmem:[%s1447_s29 + $0x8] sm:$0xff]  ;;  %v173_v27 = vld [vmem:[%s1447_s29 + $0x10] sm:$0x1f] }
  0x14   : > { %1342 = vmatpush3.bf16.msra.mxu0 %v1341_v10  ;;  %1343 = vmatprep.subr.bf16.mxu1 %v1384_v2  ;;  %v459_v31 = vld [vmem:[%s1447_s29 + $0x7] sm:$0xff]  ;;  %v558_v33 = vld [vmem:[%s1447_s29 + $0x10] sm:$0xff]  ;;  %v559_v35 = vld [vmem:[%s1447_s29 + $0x18] sm:$0x1f] }
  0x15   : > { %1247 = vmatprep.mubr.msk.f32.mxu0 %vm1385_vm0, %v1386_v4  ;;  %1346 = vmatprep.subr.bf16.mxu0 %v1384_v2  ;;  %v460_v34 = vld [vmem:[%s1447_s29 + $0xf] sm:$0xff]  ;;  %v461_v38 = vld [vmem:[%s1447_s29 + $0x17] sm:$0x1f]  ;;  %v755_v46 = vld [vmem:[%s1447_s29 + $0x1e] sm:$0x1f] }
  0x16   : > { %1228 = vmatmul.mubr.msk.f32.gmra.mrb[2].mxu1 %vm182_vm1, %v178_v15  ;;  %v753_v41 = vld [vmem:[%s1447_s29 + $0xe] sm:$0xff]  ;;  %v754_v44 = vld [vmem:[%s1447_s29 + $0x16] sm:$0xff]  ;;  %v951_v50 = vld [vmem:[%s1447_s29 + $0x20] sm:$0x1f] }
  0x17   : > { %1234 = vmatprep.mubr.msk.f32.mxu1 %vm1385_vm0, %v1386_v4  ;;  %1248 = vmatmul.mubr.msk.f32.vlgmr.msra.gmra.mrb[2].mxu0 %vm182_vm1, %v361_v18  ;;  %v656_v45 = vld [vmem:[%s1447_s29 + $0x11] sm:$0xff]  ;;  %v657_v47 = vld [vmem:[%s1447_s29 + $0x19] sm:$0x1f]  ;;  %v853_v51 = vld [vmem:[%s1447_s29 + $0x1f] sm:$0x1f] }
  0x18   : > { %1348 = vmatpush3.bf16.msra.mxu0 %v1347_v19  ;;  %1250 = vmatprep.mubr.msk.f32.mxu0 %vm1385_vm0, %v1386_v4  ;;  %v950_v48 = vld [vmem:[%s1447_s29 + $0x18] sm:$0xff] }
  0x19   : > { %1352 = vmatprep.subr.bf16.mxu0 %v1384_v2  ;;  %v852_v49 = vld [vmem:[%s1447_s29 + $0x17] sm:$0xff]  ;;  %s1364_s29 = smul.u32 24, %s1612_s13 }
  0x1a   : > { %1235 = vmatmul.mubr.msk.f32.vlgmr.msra.gmra.mrb[4].mxu1 %vm182_vm1, %v171_v20 }
  0x1b   : > { %1345 = vmatpush3.bf16.msra.mxu1 %v1344_v21  ;;  %1237 = vmatprep.mubr.msk.f32.mxu1 %vm1385_vm0, %v1386_v4  ;;  %s170_s7 = scalar_lea.vmem %s1610_s3, %s1364_s29 }
  0x1c   : > { %1251 = vmatmul.mubr.msk.f32.gmra.mrb[4].mxu0 %vm182_vm1, %v362_v22  ;;  %1349 = vmatprep.subr.bf16.mxu1 %v1384_v2 }
  0x1d   : > { %1253 = vmatprep.mubr.msk.f32.mxu0 %vm1385_vm0, %v1386_v4 }
  0x1e   : > { %1238 = vmatmul.mubr.msk.f32.gmra.mrb[6].mxu1 %vm182_vm1, %v172_v23 }
  0x1f   : > { %1240 = vmatprep.mubr.msk.f32.mxu1 %vm1385_vm0, %v1386_v4 }
  0x20   : > { %1254 = vmatmul.mubr.msk.f32.gmra.mrb[6].mxu0 %vm182_vm1, %v363_v24 }
  0x21   : > { %1273 = vmatprep.mubr.msk.f32.mxu0 %vm1385_vm0, %v1386_v4 }
  0x22   : > { %1241 = vmatmul.mubr.msk.f32.gmra.mrb[8].mxu1 %vm182_vm1, %v173_v27 }
  0x23   : > { %1260 = vmatprep.mubr.msk.f32.mxu1 %vm1385_vm0, %v1386_v4 }
  0x24   : > { %1274 = vmatmul.mubr.msk.f32.vlgmr.msra.gmra.mrb[8].mxu0 %vm182_vm1, %v172_v23 }
  0x25   : > { %1354 = vmatpush3.bf16.msra.mxu0 %v1353_v30  ;;  %1276 = vmatprep.mubr.msk.f32.mxu0 %vm1385_vm0, %v1386_v4 }
  0x26   : > { %1261 = vmatmul.mubr.msk.f32.vlgmr.msra.gmra.mrb[10].mxu1 %vm182_vm1, %v459_v31  ;;  %1358 = vmatprep.subr.bf16.mxu0 %v1384_v2 }
  0x27   : > { %1351 = vmatpush3.bf16.msra.mxu1 %v1350_v32  ;;  %1263 = vmatprep.mubr.msk.f32.mxu1 %vm1385_vm0, %v1386_v4 }
  0x28   : > { %1277 = vmatmul.mubr.msk.f32.gmra.mrb[10].mxu0 %vm182_vm1, %v558_v33  ;;  %1355 = vmatprep.subr.bf16.mxu1 %v1384_v2 }
  0x29   : > { %1279 = vmatprep.mubr.msk.f32.mxu0 %vm1385_vm0, %v1386_v4 }
  0x2a   : > { %1264 = vmatmul.mubr.msk.f32.gmra.mrb[12].mxu1 %vm182_vm1, %v460_v34 }
  0x2b   : > { %1266 = vmatprep.mubr.msk.f32.mxu1 %vm1385_vm0, %v1386_v4 }
  0x2c   : > { %1280 = vmatmul.mubr.msk.f32.gmra.mrb[12].mxu0 %vm182_vm1, %v559_v35 }
  0x2d   : > { %1299 = vmatprep.mubr.msk.f32.mxu0 %vm1385_vm0, %v1386_v4 }
  0x2e   : > { %1267 = vmatmul.mubr.msk.f32.gmra.mrb[14].mxu1 %vm182_vm1, %v461_v38 }
  0x2f   : > { %1286 = vmatprep.mubr.msk.f32.mxu1 %vm1385_vm0, %v1386_v4 }
  0x30   : > { %1300 = vmatmul.mubr.msk.f32.vlgmr.msra.gmra.mrb[14].mxu0 %vm182_vm1, %v753_v41 }
  0x31   : > { %1360 = vmatpush3.bf16.msra.mxu0 %v1359_v42  ;;  %1302 = vmatprep.mubr.msk.f32.mxu0 %vm1385_vm0, %v1386_v4 }
  0x32   : > { %1287 = vmatmul.mubr.msk.f32.vlgmr.msra.gmra.mrb[16].mxu1 %vm182_vm1, %v1453_v12 }
  0x33   : > { %1357 = vmatpush3.bf16.msra.mxu1 %v1356_v43  ;;  %1289 = vmatprep.mubr.msk.f32.mxu1 %vm1385_vm0, %v1386_v4 }
  0x34   : > { %1303 = vmatmul.mubr.msk.f32.gmra.mrb[16].mxu0 %vm182_vm1, %v754_v44 }
  0x35   : > { %1305 = vmatprep.mubr.msk.f32.mxu0 %vm1385_vm0, %v1386_v4 }
  0x36   : > { %1290 = vmatmul.mubr.msk.f32.gmra.mrb[18].mxu1 %vm182_vm1, %v656_v45 }
  0x37   : > { %1292 = vmatprep.mubr.msk.f32.mxu1 %vm1385_vm0, %v1386_v4 }
  0x38   : > { %1306 = vmatmul.mubr.msk.f32.gmra.mrb[18].mxu0 %vm182_vm1, %v755_v46 }
  0x39   : > { %1325 = vmatprep.mubr.msk.f32.mxu0 %vm1385_vm0, %v1386_v4 }
  0x3a   : > { %1293 = vmatmul.mubr.msk.f32.gmra.mrb[20].mxu1 %vm182_vm1, %v657_v47 }
  0x3b   : > { %1312 = vmatprep.mubr.msk.f32.mxu1 %vm1385_vm0, %v1386_v4 }
  0x3c   : > { %1326 = vmatmul.mubr.msk.f32.vlgmr.msra.gmra.mrb[20].mxu0 %vm182_vm1, %v558_v33 }
  0x3d   : > { %1328 = vmatprep.mubr.msk.f32.mxu0 %vm1385_vm0, %v1386_v4 }
  0x3e   : > { %1313 = vmatmul.mubr.msk.f32.vlgmr.msra.gmra.mrb[22].mxu1 %vm182_vm1, %v460_v34 }
  0x3f   : > { %1315 = vmatprep.mubr.msk.f32.mxu1 %vm1385_vm0, %v1386_v4 }
  0x40   : > { %1329 = vmatmul.mubr.msk.f32.gmra.mrb[22].mxu0 %vm182_vm1, %v950_v48 }
  0x41   : > { %1331 = vmatprep.mubr.msk.f32.mxu0 %vm1385_vm0, %v1386_v4 }
  0x42   : > { %1316 = vmatmul.mubr.msk.f32.gmra.mrb[24].mxu1 %vm182_vm1, %v852_v49 }
  0x43   : > { %1318 = vmatprep.mubr.msk.f32.mxu1 %vm1385_vm0, %v1386_v4 }
  0x44   : > { %1332 = vmatmul.mubr.msk.f32.gmra.mrb[24].mxu0 %vm182_vm1, %v951_v50 }
  0x46   : > { %1319 = vmatmul.mubr.msk.f32.gmra.mrb[26].mxu1 %vm182_vm1, %v853_v51 }
  0xe5   : > { %v263_v52 = vpop.f32.mrb[0].mxu1  ;;  %v258_v53 = vpop.f32.mrb[0].mxu0 }
  0xe6   : > { %v1226_v54 = vpop.f32.mrb[1].mxu1  ;;  %v1223_v55 = vpop.f32.mrb[1].mxu0 }
  0xe9   : > { %v268_v56 = vpop.f32.mrb[2].mxu1 }
  0xea   : > { %v1229_v57 = vpop.f32.mrb[3].mxu1  ;;  %v442_v58 = vpop.f32.mrb[2].mxu0 }
  0xeb   : > { %v1249_v59 = vpop.f32.mrb[3].mxu0 }
  0xed   : > { %v347_v60 = vpop.f32.mrb[4].mxu1 }
  0xee   : > { %v348_v61 = vadd.f32 %v347_v60, %v258_v53  ;;  %v1236_v62 = vpop.f32.mrb[5].mxu1  ;;  %v1169_v53 = vld [vmem:[%s1609_s2] ss:$0 sm:$0xff] }
  0xef   : > { %v447_v63 = vpop.f32.mrb[4].mxu0 }
  0xf0   : > { %v456_v0 = vadd.f32 %v442_v58, %v348_v61  ;;  %v1252_v1 = vpop.f32.mrb[5].mxu0 }
  0xf1   : > { %v352_v2 = vpop.f32.mrb[6].mxu1 }
  0xf2   : > { %v353_v3 = vadd.f32 %v352_v2, %v263_v52  ;;  %v1239_v4 = vpop.f32.mrb[7].mxu1 }
  0xf3   : > { %v452_v5 = vpop.f32.mrb[6].mxu0 }
  0xf4   : > { %v457_v6 = vadd.f32 %v447_v63, %v353_v3  ;;  %v1255_v7 = vpop.f32.mrb[7].mxu0 }
  0xf5   : > { %v357_v8 = vpop.f32.mrb[8].mxu1 }
  0xf6   : > { %v358_v9 = vadd.f32 %v357_v8, %v268_v56  ;;  %v1242_v10 = vpop.f32.mrb[9].mxu1 }
  0xf7   : > { %v638_v11 = vpop.f32.mrb[8].mxu0 }
  0xf8   : > { %v458_v12 = vadd.f32 %v452_v5, %v358_v9  ;;  %v1275_v13 = vpop.f32.mrb[9].mxu0 }
  0xf9   : > { %v540_v14 = vpop.f32.mrb[10].mxu1 }
  0xfa   : > { %v554_v15 = vadd.f32 %v540_v14, %v456_v0  ;;  %v1262_v16 = vpop.f32.mrb[11].mxu1 }
  0xfb   : > { %v643_v17 = vpop.f32.mrb[10].mxu0 }
  0xfc   : > { %v652_v18 = vadd.f32 %v638_v11, %v554_v15  ;;  %v1278_v19 = vpop.f32.mrb[11].mxu0 }
  0xfd   : > { %v545_v20 = vpop.f32.mrb[12].mxu1 }
  0xfe   : > { %v555_v21 = vadd.f32 %v545_v20, %v457_v6  ;;  %v1265_v22 = vpop.f32.mrb[13].mxu1 }
  0xff   : > { %v648_v23 = vpop.f32.mrb[12].mxu0 }
 0x100   : > { %v653_v24 = vadd.f32 %v643_v17, %v555_v21  ;;  %v1281_v25 = vpop.f32.mrb[13].mxu0 }
 0x101   : > { %v550_v26 = vpop.f32.mrb[14].mxu1 }
 0x102   : > { %v556_v27 = vadd.f32 %v550_v26, %v458_v12  ;;  %v1268_v28 = vpop.f32.mrb[15].mxu1 }
 0x103   : > { %v834_v29 = vpop.f32.mrb[14].mxu0 }
 0x104   : > { %v654_v30 = vadd.f32 %v648_v23, %v556_v27  ;;  %v1301_v31 = vpop.f32.mrb[15].mxu0 }
 0x105   : > { %v736_v32 = vpop.f32.mrb[16].mxu1 }
 0x106   : > { %v750_v33 = vadd.f32 %v736_v32, %v652_v18  ;;  %v1288_v34 = vpop.f32.mrb[17].mxu1 }
 0x107   : > { %v839_v35 = vpop.f32.mrb[16].mxu0 }
 0x108   : > { %v848_v36 = vadd.f32 %v834_v29, %v750_v33  ;;  %v1304_v37 = vpop.f32.mrb[17].mxu0 }
 0x109   : > { %v741_v38 = vpop.f32.mrb[18].mxu1 }
 0x10a   : > { %v751_v39 = vadd.f32 %v741_v38, %v653_v24  ;;  %v1291_v40 = vpop.f32.mrb[19].mxu1 }
 0x10b   : > { %v844_v41 = vpop.f32.mrb[18].mxu0 }
 0x10c   : > { %v849_v42 = vadd.f32 %v839_v35, %v751_v39  ;;  %v1307_v43 = vpop.f32.mrb[19].mxu0 }
 0x10d   : > { %v746_v44 = vpop.f32.mrb[20].mxu1 }
 0x10e   : > { %v752_v45 = vadd.f32 %v746_v44, %v654_v30  ;;  %v1294_v46 = vpop.f32.mrb[21].mxu1 }
 0x10f   : > { %v1030_v47 = vpop.f32.mrb[20].mxu0 }
 0x110   : > { %v850_v48 = vadd.f32 %v844_v41, %v752_v45  ;;  %v1327_v49 = vpop.f32.mrb[21].mxu0 }
 0x111   : > { %v932_v50 = vpop.f32.mrb[22].mxu1 }
 0x112   : > { %v946_v51 = vadd.f32 %v932_v50, %v848_v36  ;;  %v1314_v52 = vpop.f32.mrb[23].mxu1 }
 0x113   : > { %v1035_v54 = vpop.f32.mrb[22].mxu0 }
 0x114   : > { %v1044_v55 = vadd.f32 %v1030_v47, %v946_v51  ;;  %v1330_v56 = vpop.f32.mrb[23].mxu0 }
 0x115   : > { %v937_v57 = vpop.f32.mrb[24].mxu1 }
 0x116   : > { %v1054_v58 = vadd.f32 %v1169_v53, %v1044_v55  ;;  %v947_v59 = vadd.f32 %v937_v57, %v849_v42  ;;  %v1317_v60 = vpop.f32.mrb[25].mxu1 }
 0x117   : > { %v1040_v61 = vpop.f32.mrb[24].mxu0 }
 0x118   : > { %v1057_v62 = vmax.f32 %v1054_v58, 0.0  ;;  %v1045_v63 = vadd.f32 %v1035_v54, %v947_v59  ;;  %v1333_v0 = vpop.f32.mrb[25].mxu0 }
 0x119   : > { %v942_v1 = vpop.f32.mrb[26].mxu1 }
 0x11a   : > { %1060 = vst.msk [vmem:[%s170_s7] sm:$0xff] %vm182_vm1, %v1057_v62  ;;  %v1055_v2 = vadd.f32 %v1169_v53, %v1045_v63  ;;  %v948_v3 = vadd.f32 %v942_v1, %v850_v48  ;;  %v1320_v4 = vpop.f32.mrb[27].mxu1 }
 0x11c   : > { %v1058_v5 = vmax.f32 %v1055_v2, 0.0  ;;  %v1046_v6 = vadd.f32 %v1040_v61, %v948_v3 }
 0x11e   : > { %1061 = vst.msk [vmem:[%s170_s7 + $0x8] sm:$0xff] %vm182_vm1, %v1058_v5  ;;  %v1056_v7 = vadd.f32 %v1169_v53, %v1046_v6 }
 0x120   : > { %v1059_v8 = vmax.f32 %v1056_v7, 0.0 }
 0x122   : > { %1063 = vst.msk [vmem:[%s170_s7 + $0x10] sm:$0x1f] %vm1062_vm2, %v1059_v8 }
 0x123 PF: > { %s13_s12 = sadd.s32 1, %s1382_s12  }
 0x124   : > { %p10_p4 = scmp.ge.s32.totalorder %s13_s12, 4  }
 0x126   :  { %12 = sbr.rel (!%p10_p4) target bundleno = 1 (0x1), region = 70 }

// kernel: _forward_impl.7
= control target key start
LH: loop header
LB: loop body
LE: loop exit
PB: predicated region body
PF: predicated region fallthrough
CT: control target
= control target key end

     0   :  { %v337_v3 = vmov 0.0|0.0   ;;  %vm338_vm0 = vmmov 0   ;;  %v339_v4 = vmov 0.0   ;;  %vm66_vm1 = vcmask 654336   ;;  %s506_s1 = inlined_call_operand.vmem [shape: f32[336,32], index: 1, kind: input, shape index: {}]   ;;  %s507_s0 = inlined_call_operand.vmem [shape: f32[8,336], index: 0, kind: input, shape index: {}]   ;;  %s508_s2 = inlined_call_operand.vmem [shape: f32[1,32], index: 2, kind: input, shape index: {}]   ;;  %s509_s3 = inlined_call_operand.vmem [shape: f32[8,32], index: 3, kind: output, shape index: {}]  }
   0x1   :  { %v33_v0 = vld [vmem:[%s506_s1 + $0x80] sm:$0xff]  ;;  %v34_v1 = vld [vmem:[%s506_s1 + $0x88] sm:$0xff]  ;;  %319 = vmatprep.subr.bf16.mxu1 %v337_v3  ;;  %284 = vmatprep.mubr.msk.f32.mxu1 %vm338_vm0, %v339_v4  ;;  %v35_v7 = vld [vmem:[%s506_s1 + $0x90] sm:$0xff]  ;;  %vm210_vm2 = vcmask 261120  }
   0x2   :  { %v17_v2 = vld [vmem:[%s506_s1] sm:$0xff]  ;;  %v287_v5 = vpack.c.bf16 %v34_v1, %v33_v0  ;;  %v18_v6 = vld [vmem:[%s506_s1 + $0x8] sm:$0xff]  ;;  %v36_v8 = vld [vmem:[%s506_s1 + $0x98] sm:$0xff] }
   0x3   :  { %v289_v9 = vpack.c.bf16 %v18_v6, %v17_v2  ;;  %v291_v10 = vpack.c.bf16 %v36_v8, %v35_v7  ;;  %v19_v11 = vld [vmem:[%s506_s1 + $0x10] sm:$0xff]  ;;  %v20_v12 = vld [vmem:[%s506_s1 + $0x18] sm:$0xff]  ;;  %v37_v13 = vld [vmem:[%s506_s1 + $0xa0] sm:$0xff] }
   0x4   :  { %288 = vmatprep.subr.bf16.mxu0 %v287_v5  ;;  %v38_v14 = vld [vmem:[%s506_s1 + $0xa8] sm:$0xff]  ;;  %v293_v15 = vpack.c.bf16 %v20_v12, %v19_v11  ;;  %v21_v17 = vld [vmem:[%s506_s1 + $0x20] sm:$0xff]  ;;  %v39_v19 = vld [vmem:[%s506_s1 + $0xb0] sm:$0xff] }
   0x5   :  { %290 = vmatpush3.bf16.msra.mxu0 %v289_v9  ;;  %v295_v16 = vpack.c.bf16 %v38_v14, %v37_v13  ;;  %v22_v18 = vld [vmem:[%s506_s1 + $0x28] sm:$0xff]  ;;  %v40_v20 = vld [vmem:[%s506_s1 + $0xb8] sm:$0xff]  ;;  %v49_v21 = vld [vmem:[%s506_s1 + $0x100] sm:$0xff] }
   0x6   :  { %292 = vmatprep.subr.bf16.mxu0 %v291_v10  ;;  %v50_v22 = vld [vmem:[%s506_s1 + $0x108] sm:$0xff]  ;;  %v297_v23 = vpack.c.bf16 %v22_v18, %v21_v17  ;;  %v51_v25 = vld [vmem:[%s506_s1 + $0x110] sm:$0xff]  ;;  %v299_v26 = vpack.c.bf16 %v40_v20, %v39_v19  ;;  %v24_v28 = vld [vmem:[%s506_s1 + $0x38] sm:$0xff] }
   0x7   :  { %v320_v24 = vpack.c.bf16 %v50_v22, %v49_v21  ;;  %v23_v27 = vld [vmem:[%s506_s1 + $0x30] sm:$0xff]  ;;  %v52_v29 = vld [vmem:[%s506_s1 + $0x118] sm:$0xff]  ;;  %v41_v30 = vld [vmem:[%s506_s1 + $0xc0] sm:$0xff] }
   0x8   :  { %v42_v31 = vld [vmem:[%s506_s1 + $0xc8] sm:$0xff]  ;;  %v323_v32 = vpack.c.bf16 %v52_v29, %v51_v25  ;;  %v53_v33 = vld [vmem:[%s506_s1 + $0x120] sm:$0xff]  ;;  %v301_v35 = vpack.c.bf16 %v24_v28, %v23_v27  ;;  %v43_v40 = vld [vmem:[%s506_s1 + $0xd0] sm:$0xff] }
   0x9   :  { %294 = vmatpush3.bf16.msra.mxu0 %v293_v15  ;;  %321 = vmatpush3.bf16.msra.mxu1 %v320_v24  ;;  %v54_v34 = vld [vmem:[%s506_s1 + $0x128] sm:$0xff]  ;;  %v303_v36 = vpack.c.bf16 %v42_v31, %v41_v30  ;;  %v25_v37 = vld [vmem:[%s506_s1 + $0x40] sm:$0xff]  ;;  %v44_v41 = vld [vmem:[%s506_s1 + $0xd8] sm:$0xff] }
   0xa   :  { %296 = vmatprep.subr.bf16.mxu0 %v295_v16  ;;  %322 = vmatprep.subr.bf16.mxu1 %v337_v3  ;;  %v26_v38 = vld [vmem:[%s506_s1 + $0x48] sm:$0xff]  ;;  %v326_v42 = vpack.c.bf16 %v54_v34, %v53_v33  ;;  %v55_v43 = vld [vmem:[%s506_s1 + $0x130] sm:$0xff]  ;;  %v56_v44 = vld [vmem:[%s506_s1 + $0x138] sm:$0xff]  ;;  %v307_v46 = vpack.c.bf16 %v44_v41, %v43_v40 }
   0xb   :  { %v15_v39 = vld [vmem:[%s507_s0 + $0x8] sm:$0xff]  ;;  %v305_v45 = vpack.c.bf16 %v26_v38, %v25_v37  ;;  %v27_v47 = vld [vmem:[%s506_s1 + $0x50] sm:$0xff]  ;;  %v28_v48 = vld [vmem:[%s506_s1 + $0x58] sm:$0xff]  ;;  %v329_v51 = vpack.c.bf16 %v56_v44, %v55_v43 }
   0xc   :  { %134 = vmatprep.mubr.f32.mxu0 %v15_v39  ;;  %v45_v49 = vld [vmem:[%s506_s1 + $0xe0] sm:$0xff]  ;;  %v46_v50 = vld [vmem:[%s506_s1 + $0xe8] sm:$0xff]  ;;  %v309_v54 = vpack.c.bf16 %v28_v48, %v27_v47  ;;  %v47_v58 = vld [vmem:[%s506_s1 + $0xf0] sm:$0xff] }
   0xd   :  { %298 = vmatpush3.bf16.msra.mxu0 %v297_v23  ;;  %324 = vmatpush3.bf16.msra.mxu1 %v323_v32  ;;  %v57_v52 = vld [vmem:[%s506_s1 + $0x140] sm:$0xff]  ;;  %v58_v53 = vld [vmem:[%s506_s1 + $0x148] sm:$0xff]  ;;  %v311_v55 = vpack.c.bf16 %v46_v50, %v45_v49  ;;  %v48_v59 = vld [vmem:[%s506_s1 + $0xf8] sm:$0xff] }
   0xe   :  { %300 = vmatprep.subr.bf16.mxu0 %v299_v26  ;;  %325 = vmatprep.subr.bf16.mxu1 %v337_v3  ;;  %v29_v56 = vld [vmem:[%s506_s1 + $0x60] sm:$0xff]  ;;  %v30_v57 = vld [vmem:[%s506_s1 + $0x68] sm:$0xff]  ;;  %v332_v60 = vpack.c.bf16 %v58_v53, %v57_v52  ;;  %v315_v62 = vpack.c.bf16 %v48_v59, %v47_v58  ;;  %v31_v63 = vld [vmem:[%s506_s1 + $0x70] sm:$0xff] }
   0xf   :  { %v313_v61 = vpack.c.bf16 %v30_v57, %v29_v56  ;;  %v32_v0 = vld [vmem:[%s506_s1 + $0x78] sm:$0xff]  ;;  %v16_v1 = vld [vmem:[%s507_s0 + $0x10] sm:$0xff]  ;;  %v216_v8 = vld [vmem:[%s508_s2] ss:$0 sm:$0xff] }
  0x10   :  { %v317_v2 = vpack.c.bf16 %v32_v0, %v31_v63 }
  0x11   :  { %302 = vmatpush3.bf16.msra.mxu0 %v301_v35  ;;  %327 = vmatpush3.bf16.msra.mxu1 %v326_v42 }
  0x12   :  { %304 = vmatprep.subr.bf16.mxu0 %v303_v36  ;;  %328 = vmatprep.subr.bf16.mxu1 %v337_v3 }
  0x15   :  { %306 = vmatpush3.bf16.msra.mxu0 %v305_v45  ;;  %330 = vmatpush3.bf16.msra.mxu1 %v329_v51 }
  0x16   :  { %308 = vmatprep.subr.bf16.mxu0 %v307_v46  ;;  %331 = vmatprep.subr.bf16.mxu1 %v337_v3  ;;  %v14_v3 = vld [vmem:[%s507_s0] sm:$0xff] }
  0x19   :  { %310 = vmatpush3.bf16.msra.mxu0 %v309_v54  ;;  %333 = vmatpush3.bf16.msra.mxu1 %v332_v60 }
  0x1a   :  { %312 = vmatprep.subr.bf16.mxu0 %v311_v55 }
  0x1c   :  { %285 = vmatmul.mubr.msk.f32.vlgmr.msra.gmra.mrb[0].mxu1 %vm66_vm1, %v16_v1 }
  0x1d   :  { %314 = vmatpush3.bf16.msra.mxu0 %v313_v61 }
  0x1e   :  { %316 = vmatprep.subr.bf16.mxu0 %v315_v62 }
  0x21   :  { %318 = vmatpush3.bf16.msra.mxu0 %v317_v2 }
  0x24   :  { %135 = vmatmul.mubr.f32.vlgmr.msra.gmra.mrb[0].mxu0 %v14_v3 }
  0xef   :  { %v206_v4 = vpop.f32.mrb[0].mxu1 }
  0xf0   :  { %v286_v5 = vpop.f32.mrb[1].mxu1 }
  0xf7   :  { %v250_v6 = vpop.f32.mrb[0].mxu0 }
  0xf8   :  { %v251_v7 = vpop.f32.mrb[1].mxu0 }
  0xf9   :  { %v252_v9 = vadd.f32 %v251_v7, %v250_v6 }
  0xfb   :  { %v137_v10 = vadd.f32 %v252_v9, %v216_v8 }
  0xfd   :  { %v207_v11 = vadd.f32 %v206_v4, %v137_v10 }
  0xff   :  { %211 = vst.msk [vmem:[%s509_s3] sm:$0xff] %vm210_vm2, %v207_v11 }

</bundles_post_ra>
